<compile_context>
chip_gen: v7x
topology: tpu7x:2x2x1
jax: 0.10.0
libtpu: 0.0.40
codegen_flags: <defaults>
</compile_context>

<pallas_src>
import inspect

import jax
import jax.numpy as jnp
import numpy as np
from jax.experimental import pallas as pl
from jax.experimental.pallas import tpu as pltpu

LN_EPS = 1e-5          # torch.nn.LayerNorm default eps
NORM_EPS = 1e-12       # torch F.normalize default eps
_GELU_C = 0.7978845608028654   # sqrt(2/pi)


def _layernorm(t, gamma, beta):
    mu = jnp.mean(t, axis=-1, keepdims=True)
    var = jnp.mean(jnp.square(t - mu), axis=-1, keepdims=True)
    return (t - mu) * jax.lax.rsqrt(var + LN_EPS) * gamma + beta


def make_kernel(num_heads):
    def kernel(x_ref, kblk_ref, vblk_ref,
               g1_ref, b1_ref, qw_ref, ls_ref,
               pw_ref, pb_ref, g2_ref, b2_ref,
               w1_ref, fb1_ref, w2_ref, fb2_ref,
               o_ref):
        f32 = jnp.float32
        bf16 = jnp.bfloat16

        x = x_ref[0]                               # (TN, C) f32
        TN, C = x.shape
        hd = C // num_heads

        # norm1(x) -> q projection (bf16 MXU operands, f32 accumulation).
        xn = _layernorm(x, g1_ref[0], b1_ref[0])
        q = jnp.dot(xn.astype(bf16), qw_ref[...], preferred_element_type=f32)

        # Per-head L2 normalization (F.normalize) with learn_scale folded in:
        # relu((q_n * ls) @ k_n^T) == relu((q_n @ k_n^T) * ls).
        q3 = q.reshape(TN, num_heads, hd)
        inv = jax.lax.rsqrt(jnp.maximum(jnp.sum(q3 * q3, axis=-1, keepdims=True),
                                        NORM_EPS * NORM_EPS))
        qs = ((q3 * inv).reshape(TN, C) * ls_ref[0]).astype(bf16)

        # Head-block-diagonal attention: two lane-dense 2D matmuls.
        s = jnp.dot(qs, kblk_ref[0], preferred_element_type=f32)         # (TN, H*P)
        a = jnp.maximum(s, 0.0).astype(bf16)                             # ReLU attn
        attn_out = jnp.dot(a, vblk_ref[0], preferred_element_type=f32)   # (TN, C)

        # proj (this is the block's residual stream y).
        y = jnp.dot(attn_out.astype(bf16), pw_ref[...],
                    preferred_element_type=f32) + pb_ref[0]

        # x = drop_path(y); x = x + drop_path(mlp(norm2(x)))   (identity paths)
        xn2 = _layernorm(y, g2_ref[0], b2_ref[0])
        h1 = jnp.dot(xn2.astype(bf16), w1_ref[...],
                     preferred_element_type=f32) + fb1_ref[0]
        # tanh-GELU: transcendental goes to the EUP slot (frees the VALU on the
        # (TN, 4C) tensor); difference vs exact erf-GELU is ~1e-3, well inside
        # the bf16-matmul tolerance.
        h1 = 0.5 * h1 * (1.0 + jnp.tanh(_GELU_C * (h1 + 0.044715 * h1 * h1 * h1)))
        h2 = jnp.dot(h1.astype(bf16), w2_ref[...],
                     preferred_element_type=f32) + fb2_ref[0]

        o_ref[0] = (y + h2).astype(o_ref.dtype)
    return kernel


def _supports_pipeline_mode():
    if not hasattr(pl, "Buffered"):
        return False
    try:
        return "pipeline_mode" in inspect.signature(pl.BlockSpec).parameters
    except (TypeError, ValueError):
        return False


def _device_vmem_bytes():
    try:
        return int(pltpu.get_tpu_info().vmem_capacity_bytes)
    except Exception:
        return 64 << 20        # conservative default: v7x per-TensorCore VMEM


def _pick_token_tile(N):
    # 256-row tiles fill the 2x256^2 MXU on v6e/v7x; harmless on v5e.
    if N <= 256:
        return N
    for tn in (256, 128):
        if N % tn == 0:
            return tn
    return 256                 # ragged tail handled by Pallas OOB masking


def prototype_block(x, proto, params, num_heads):
    B, N, C = x.shape
    P = proto.shape[1]
    H = num_heads
    assert C % H == 0, "dim must be divisible by num_heads"
    hd = C // H
    hidden = params["w1"].shape[1]
    # NOTE: for real configs prefer C, hidden multiples of 128 (lane-dense).
    f32, bf16 = jnp.float32, jnp.bfloat16

    # ---- hoisted prototype path: depends only on b, never on token tiles ----
    g1 = params["g1"].reshape(1, 1, C).astype(f32)
    b1 = params["b1"].reshape(1, 1, C).astype(f32)
    mu = proto.mean(-1, keepdims=True)
    var = jnp.square(proto - mu).mean(-1, keepdims=True)
    pn = (proto - mu) * jax.lax.rsqrt(var + LN_EPS) * g1 + b1     # norm1(proto)
    kv = pn @ params["kvw"].astype(f32)                            # (B, P, 2C)
    k3 = kv[..., :C].reshape(B, P, H, hd)
    v3 = kv[..., C:].reshape(B, P, H, hd)
    k3 = k3 * jax.lax.rsqrt(jnp.maximum(jnp.sum(k3 * k3, -1, keepdims=True),
                                        NORM_EPS * NORM_EPS))      # F.normalize(k)
    # Head-block-diagonal K / V (zero off-head blocks) so the kernel does
    # attention as two dense 2D matmuls with a lane-dense (TN, C) result.
    eye = jnp.eye(H, dtype=f32)
    kblk = jnp.einsum("bphd,hg->bhdgp", k3, eye).reshape(B, C, H * P).astype(bf16)
    vblk = jnp.einsum("bphd,hg->bgphd", v3, eye).reshape(B, H * P, C).astype(bf16)

    # learn_scale expanded per head to a (1, C) row, folded into q in-kernel.
    ls_row = jnp.repeat(params["ls"].astype(f32).reshape(H), hd).reshape(1, C)

    qw = params["qw"].astype(bf16)
    pw = params["pw"].astype(bf16)
    w1 = params["w1"].astype(bf16)
    w2 = params["w2"].astype(bf16)

    TN = _pick_token_tile(N)
    n_tiles = pl.cdiv(N, TN)
    HP = H * P

    def build(single_buffer_weights):
        def wspec(shape):
            kw = {}
            if single_buffer_weights:
                # Constant-index weights: one buffer is enough, save VMEM.
                kw["pipeline_mode"] = pl.Buffered(1)
            return pl.BlockSpec(shape, lambda b, n: (0,) * len(shape), **kw)

        in_specs = [
            pl.BlockSpec((1, TN, C), lambda b, n: (b, n, 0)),     # x tile
            pl.BlockSpec((1, C, HP), lambda b, n: (b, 0, 0)),     # K block-diag
            pl.BlockSpec((1, HP, C), lambda b, n: (b, 0, 0)),     # V block-diag
            wspec((1, C)), wspec((1, C)),                         # norm1 gamma/beta
            wspec((C, C)),                                        # q weight (bf16)
            wspec((1, C)),                                        # learn_scale row
            wspec((C, C)), wspec((1, C)),                         # proj w / b
            wspec((1, C)), wspec((1, C)),                         # norm2 gamma/beta
            wspec((C, hidden)), wspec((1, hidden)),               # fc1 w / b
            wspec((hidden, C)), wspec((1, C)),                    # fc2 w / b
        ]
        out_specs = pl.BlockSpec((1, TN, C), lambda b, n: (b, n, 0))

        # VMEM budget: bf16 weights (+buffering) + K/V blocks + activation
        # tiles + live f32 intermediates + headroom, clamped to device VMEM.
        wbuf = 1 if single_buffer_weights else 2
        weight_bytes = 2 * (qw.size + pw.size + w1.size + w2.size) * wbuf
        small_bytes = 4 * (7 * C + hidden) * wbuf
        kv_bytes = 2 * 2 * 2 * C * HP                      # K/V blocks, 2-deep
        act_bytes = 4 * 2 * TN * C * 2                     # x / out tiles, 2-deep
        interm_bytes = 4 * TN * (hidden + 8 * C + 2 * HP)  # live f32 temporaries
        vmem_limit = int(weight_bytes + small_bytes + kv_bytes
                         + act_bytes + interm_bytes) + (8 << 20)
        vmem_cap = int(0.85 * _device_vmem_bytes())        # never above physical
        vmem_limit = min(max(vmem_limit, 32 << 20), vmem_cap)

        flops = int(2 * B * N * C * (2 * C + 2 * hidden + 2 * HP))
        transcendentals = int(B * N * (hidden + H + 2))
        bytes_accessed = int(8 * B * N * C                  # x in + out (f32)
                             + 4 * B * C * HP               # K/V blocks (bf16)
                             + 2 * (qw.size + pw.size + w1.size + w2.size))

        return pl.pallas_call(
            make_kernel(H),
            out_shape=jax.ShapeDtypeStruct((B, N, C), x.dtype),
            grid=(B, n_tiles),
            in_specs=in_specs,
            out_specs=out_specs,
            compiler_params=pltpu.CompilerParams(
                dimension_semantics=("parallel", "parallel"),
                vmem_limit_bytes=vmem_limit),
            cost_estimate=pl.CostEstimate(
                flops=flops, transcendentals=transcendentals,
                bytes_accessed=bytes_accessed),
        )(x, kblk, vblk,
          params["g1"], params["b1"], qw, ls_row,
          pw, params["pb"], params["g2"], params["b2"],
          w1, params["fb1"], w2, params["fb2"])

    if _supports_pipeline_mode():
        try:
            return build(True)
        except Exception:
            # TODO(synk): pl.Buffered(1) rejected by this jax/Mosaic build; fall
            # back to default double-buffered weights -- any genuine kernel
            # error will resurface (not be masked) from the fallback build.
            pass
    return build(False)


def reference(x, proto, params, num_heads):
    """Pure-JAX f32 reference mirroring the PyTorch forward."""
    B, N, C = x.shape
    P = proto.shape[1]
    hd = C // num_heads

    def ln(t, g, b):
        mu = t.mean(-1, keepdims=True)
        var = ((t - mu) ** 2).mean(-1, keepdims=True)
        return (t - mu) / jnp.sqrt(var + LN_EPS) * g + b

    g1, b1 = params["g1"][0], params["b1"][0]
    xn = ln(x, g1, b1)
    pn = ln(proto, g1, b1)
    q = xn @ params["qw"]
    kv = pn @ params["kvw"]
    k, v = kv[..., :C], kv[..., C:]
    q = q.reshape(B, N, num_heads, hd).transpose(0, 2, 1, 3)
    k = k.reshape(B, P, num_heads, hd).transpose(0, 2, 1, 3)
    v = v.reshape(B, P, num_heads, hd).transpose(0, 2, 1, 3)
    q = q / jnp.maximum(jnp.linalg.norm(q, axis=-1, keepdims=True), NORM_EPS)
    k = k / jnp.maximum(jnp.linalg.norm(k, axis=-1, keepdims=True), NORM_EPS)
    ls = params["ls"].reshape(1, num_heads, 1, 1)
    attn = jnp.maximum(jnp.einsum("bhnd,bhpd->bhnp", q, k) * ls, 0.0)
    y = jnp.einsum("bhnp,bhpd->bhnd", attn, v).transpose(0, 2, 1, 3).reshape(B, N, C)
    y = y @ params["pw"] + params["pb"][0]
    xn2 = ln(y, params["g2"][0], params["b2"][0])
    h1 = jax.nn.gelu(xn2 @ params["w1"] + params["fb1"][0], approximate=False)
    h2 = h1 @ params["w2"] + params["fb2"][0]
    return y + h2


if __name__ == "__main__":
    B, N, P, C, H = 2, 8, 4, 32, 4           # batch, tokens, prototypes, dim, heads
    hidden = int(C * 4.0)

    key = jax.random.PRNGKey(0)
    ks = jax.random.split(key, 16)

    def nrm(k, shape, s=0.02):
        return s * jax.random.normal(k, shape, jnp.float32)

    x = jax.random.normal(ks[0], (B, N, C), jnp.float32)
    proto = jax.random.normal(ks[1], (B, P, C), jnp.float32)

    params = dict(
        g1=1.0 + nrm(ks[2], (1, C)), b1=nrm(ks[3], (1, C)),
        qw=nrm(ks[4], (C, C)),                      # q: Linear(dim, dim, bias=False)
        kvw=nrm(ks[5], (C, 2 * C)),                 # kv: Linear(dim, 2*dim, bias=False)
        ls=1.0 + nrm(ks[6], (H,)),                  # learn_scale (flattened (H,1,1))
        pw=nrm(ks[7], (C, C)), pb=nrm(ks[8], (1, C)),
        g2=1.0 + nrm(ks[9], (1, C)), b2=nrm(ks[10], (1, C)),
        w1=nrm(ks[11], (C, hidden)), fb1=nrm(ks[12], (1, hidden)),
        w2=nrm(ks[13], (hidden, C)), fb2=nrm(ks[14], (1, C)),
    )

    out = prototype_block(x, proto, params, H)
    jax.block_until_ready(out)

    ref = reference(x, proto, params, H)
    # bf16 MXU operands with f32 accumulation + tanh-GELU -> loose tolerance.
    np.testing.assert_allclose(np.asarray(out), np.asarray(ref),
                               rtol=1e-2, atol=1e-2)
    print("KERNEL_OK")
</pallas_src>

<mosaic_0001>
module attributes {stable_mosaic.version = 11 : i64} {
  func.func @kernel(%arg0: i32, %arg1: i32, %arg2: memref<1x8x32xf32, #tpu.memory_space<vmem>>, %arg3: memref<1x32x16xbf16, #tpu.memory_space<vmem>>, %arg4: memref<1x16x32xbf16, #tpu.memory_space<vmem>>, %arg5: memref<1x32xf32, #tpu.memory_space<vmem>>, %arg6: memref<1x32xf32, #tpu.memory_space<vmem>>, %arg7: memref<32x32xbf16, #tpu.memory_space<vmem>>, %arg8: memref<1x32xf32, #tpu.memory_space<vmem>>, %arg9: memref<32x32xbf16, #tpu.memory_space<vmem>>, %arg10: memref<1x32xf32, #tpu.memory_space<vmem>>, %arg11: memref<1x32xf32, #tpu.memory_space<vmem>>, %arg12: memref<1x32xf32, #tpu.memory_space<vmem>>, %arg13: memref<32x128xbf16, #tpu.memory_space<vmem>>, %arg14: memref<1x128xf32, #tpu.memory_space<vmem>>, %arg15: memref<128x32xbf16, #tpu.memory_space<vmem>>, %arg16: memref<1x32xf32, #tpu.memory_space<vmem>>, %arg17: memref<1x8x32xf32, #tpu.memory_space<vmem>>) attributes {dimension_semantics = [#tpu.dimension_semantics<parallel>, #tpu.dimension_semantics<parallel>], iteration_bounds = array<i64: 2, 1>, scalar_prefetch = 0 : i64, scratch_operands = 0 : i64, tpu.core_type = #tpu.core_type<tc>, window_params = [{transform_indices = @transform_0, window_bounds = array<i64: 1, 8, 32>}, {transform_indices = @transform_1, window_bounds = array<i64: 1, 32, 16>}, {transform_indices = @transform_2, window_bounds = array<i64: 1, 16, 32>}, {pipeline_mode = #tpu.pipeline_mode<synchronous>, transform_indices = @transform_3, window_bounds = array<i64: 1, 32>}, {pipeline_mode = #tpu.pipeline_mode<synchronous>, transform_indices = @transform_4, window_bounds = array<i64: 1, 32>}, {pipeline_mode = #tpu.pipeline_mode<synchronous>, transform_indices = @transform_5, window_bounds = array<i64: 32, 32>}, {pipeline_mode = #tpu.pipeline_mode<synchronous>, transform_indices = @transform_6, window_bounds = array<i64: 1, 32>}, {pipeline_mode = #tpu.pipeline_mode<synchronous>, transform_indices = @transform_7, window_bounds = array<i64: 32, 32>}, {pipeline_mode = #tpu.pipeline_mode<synchronous>, transform_indices = @transform_8, window_bounds = array<i64: 1, 32>}, {pipeline_mode = #tpu.pipeline_mode<synchronous>, transform_indices = @transform_9, window_bounds = array<i64: 1, 32>}, {pipeline_mode = #tpu.pipeline_mode<synchronous>, transform_indices = @transform_10, window_bounds = array<i64: 1, 32>}, {pipeline_mode = #tpu.pipeline_mode<synchronous>, transform_indices = @transform_11, window_bounds = array<i64: 32, 128>}, {pipeline_mode = #tpu.pipeline_mode<synchronous>, transform_indices = @transform_12, window_bounds = array<i64: 1, 128>}, {pipeline_mode = #tpu.pipeline_mode<synchronous>, transform_indices = @transform_13, window_bounds = array<i64: 128, 32>}, {pipeline_mode = #tpu.pipeline_mode<synchronous>, transform_indices = @transform_14, window_bounds = array<i64: 1, 32>}, {transform_indices = @transform_15, window_bounds = array<i64: 1, 8, 32>}]} {
    %c0 = arith.constant 0 : index
    %c0_0 = arith.constant 0 : index
    %c0_1 = arith.constant 0 : index
    %0 = vector.load %arg2[%c0, %c0_0, %c0_1] : memref<1x8x32xf32, #tpu.memory_space<vmem>>, vector<1x8x32xf32>
    %1 = vector.shape_cast %0 : vector<1x8x32xf32> to vector<8x32xf32>
    %c0_2 = arith.constant 0 : index
    %c0_3 = arith.constant 0 : index
    %2 = vector.load %arg5[%c0_2, %c0_3] : memref<1x32xf32, #tpu.memory_space<vmem>>, vector<1x32xf32>
    %3 = vector.shape_cast %2 : vector<1x32xf32> to vector<32xf32>
    %c0_4 = arith.constant 0 : index
    %c0_5 = arith.constant 0 : index
    %4 = vector.load %arg6[%c0_4, %c0_5] : memref<1x32xf32, #tpu.memory_space<vmem>>, vector<1x32xf32>
    %5 = vector.shape_cast %4 : vector<1x32xf32> to vector<32xf32>
    %cst = arith.constant dense<0.000000e+00> : vector<8xf32>
    %6 = vector.multi_reduction <add>, %1, %cst [1] : vector<8x32xf32> to vector<8xf32>
    %7 = vector.shape_cast %6 : vector<8xf32> to vector<8x1xf32>
    %cst_6 = arith.constant 3.200000e+01 : f32
    %8 = vector.broadcast %cst_6 : f32 to vector<8x1xf32>
    %9 = arith.divf %7, %8 : vector<8x1xf32>
    %10 = vector.broadcast %9 : vector<8x1xf32> to vector<8x32xf32>
    %11 = arith.subf %1, %10 : vector<8x32xf32>
    %12 = arith.mulf %11, %11 : vector<8x32xf32>
    %cst_7 = arith.constant dense<0.000000e+00> : vector<8xf32>
    %13 = vector.multi_reduction <add>, %12, %cst_7 [1] : vector<8x32xf32> to vector<8xf32>
    %14 = vector.shape_cast %13 : vector<8xf32> to vector<8x1xf32>
    %cst_8 = arith.constant 3.200000e+01 : f32
    %15 = vector.broadcast %cst_8 : f32 to vector<8x1xf32>
    %16 = arith.divf %14, %15 : vector<8x1xf32>
    %17 = vector.broadcast %9 : vector<8x1xf32> to vector<8x32xf32>
    %18 = arith.subf %1, %17 : vector<8x32xf32>
    %cst_9 = arith.constant 9.99999974E-6 : f32
    %19 = vector.broadcast %cst_9 : f32 to vector<8x1xf32>
    %20 = arith.addf %16, %19 : vector<8x1xf32>
    %21 = math.rsqrt %20 : vector<8x1xf32>
    %22 = vector.broadcast %21 : vector<8x1xf32> to vector<8x32xf32>
    %23 = arith.mulf %18, %22 : vector<8x32xf32>
    %24 = vector.shape_cast %3 : vector<32xf32> to vector<1x32xf32>
    %25 = vector.broadcast %24 : vector<1x32xf32> to vector<8x32xf32>
    %26 = arith.mulf %23, %25 : vector<8x32xf32>
    %27 = vector.shape_cast %5 : vector<32xf32> to vector<1x32xf32>
    %28 = vector.broadcast %27 : vector<1x32xf32> to vector<8x32xf32>
    %29 = arith.addf %26, %28 : vector<8x32xf32>
    %30 = arith.truncf %29 : vector<8x32xf32> to vector<8x32xbf16>
    %c0_10 = arith.constant 0 : index
    %c0_11 = arith.constant 0 : index
    %31 = vector.load %arg7[%c0_10, %c0_11] : memref<32x32xbf16, #tpu.memory_space<vmem>>, vector<32x32xbf16>
    %cst_12 = arith.constant dense<0.000000e+00> : vector<8x32xf32>
    %32 = tpu.matmul %30, %31, %cst_12 {dimension_numbers = #tpu.dot_dimension_numbers<[1], [0], [0], [1], [0, 0, 1, 1], [], []>} : vector<8x32xbf16>, vector<32x32xbf16>, vector<8x32xf32> -> vector<8x32xf32>
    %33 = vector.shape_cast %32 : vector<8x32xf32> to vector<8x4x8xf32>
    %34 = arith.mulf %33, %33 : vector<8x4x8xf32>
    %cst_13 = arith.constant dense<0.000000e+00> : vector<8x4xf32>
    %35 = vector.multi_reduction <add>, %34, %cst_13 [2] : vector<8x4x8xf32> to vector<8x4xf32>
    %36 = vector.shape_cast %35 : vector<8x4xf32> to vector<8x4x1xf32>
    %cst_14 = arith.constant 1.000000e-24 : f32
    %37 = vector.broadcast %cst_14 : f32 to vector<8x4x1xf32>
    %38 = arith.maximumf %36, %37 : vector<8x4x1xf32>
    %39 = math.rsqrt %38 : vector<8x4x1xf32>
    %40 = vector.broadcast %39 : vector<8x4x1xf32> to vector<8x4x8xf32>
    %41 = arith.mulf %33, %40 : vector<8x4x8xf32>
    %42 = vector.shape_cast %41 : vector<8x4x8xf32> to vector<8x32xf32>
    %c0_15 = arith.constant 0 : index
    %c0_16 = arith.constant 0 : index
    %43 = vector.load %arg8[%c0_15, %c0_16] : memref<1x32xf32, #tpu.memory_space<vmem>>, vector<1x32xf32>
    %44 = vector.shape_cast %43 : vector<1x32xf32> to vector<32xf32>
    %45 = vector.shape_cast %44 : vector<32xf32> to vector<1x32xf32>
    %46 = vector.broadcast %45 : vector<1x32xf32> to vector<8x32xf32>
    %47 = arith.mulf %42, %46 : vector<8x32xf32>
    %48 = arith.truncf %47 : vector<8x32xf32> to vector<8x32xbf16>
    %c0_17 = arith.constant 0 : index
    %c0_18 = arith.constant 0 : index
    %c0_19 = arith.constant 0 : index
    %49 = vector.load %arg3[%c0_17, %c0_18, %c0_19] : memref<1x32x16xbf16, #tpu.memory_space<vmem>>, vector<1x32x16xbf16>
    %50 = vector.shape_cast %49 : vector<1x32x16xbf16> to vector<32x16xbf16>
    %cst_20 = arith.constant dense<0.000000e+00> : vector<8x16xf32>
    %51 = tpu.matmul %48, %50, %cst_20 {dimension_numbers = #tpu.dot_dimension_numbers<[1], [0], [0], [1], [0, 0, 1, 1], [], []>} : vector<8x32xbf16>, vector<32x16xbf16>, vector<8x16xf32> -> vector<8x16xf32>
    %cst_21 = arith.constant 0.000000e+00 : f32
    %52 = vector.broadcast %cst_21 : f32 to vector<8x16xf32>
    %53 = arith.maximumf %51, %52 : vector<8x16xf32>
    %54 = arith.truncf %53 : vector<8x16xf32> to vector<8x16xbf16>
    %c0_22 = arith.constant 0 : index
    %c0_23 = arith.constant 0 : index
    %c0_24 = arith.constant 0 : index
    %55 = vector.load %arg4[%c0_22, %c0_23, %c0_24] : memref<1x16x32xbf16, #tpu.memory_space<vmem>>, vector<1x16x32xbf16>
    %56 = vector.shape_cast %55 : vector<1x16x32xbf16> to vector<16x32xbf16>
    %cst_25 = arith.constant dense<0.000000e+00> : vector<8x32xf32>
    %57 = tpu.matmul %54, %56, %cst_25 {dimension_numbers = #tpu.dot_dimension_numbers<[1], [0], [0], [1], [0, 0, 1, 1], [], []>} : vector<8x16xbf16>, vector<16x32xbf16>, vector<8x32xf32> -> vector<8x32xf32>
    %58 = arith.truncf %57 : vector<8x32xf32> to vector<8x32xbf16>
    %c0_26 = arith.constant 0 : index
    %c0_27 = arith.constant 0 : index
    %59 = vector.load %arg9[%c0_26, %c0_27] : memref<32x32xbf16, #tpu.memory_space<vmem>>, vector<32x32xbf16>
    %cst_28 = arith.constant dense<0.000000e+00> : vector<8x32xf32>
    %60 = tpu.matmul %58, %59, %cst_28 {dimension_numbers = #tpu.dot_dimension_numbers<[1], [0], [0], [1], [0, 0, 1, 1], [], []>} : vector<8x32xbf16>, vector<32x32xbf16>, vector<8x32xf32> -> vector<8x32xf32>
    %c0_29 = arith.constant 0 : index
    %c0_30 = arith.constant 0 : index
    %61 = vector.load %arg10[%c0_29, %c0_30] : memref<1x32xf32, #tpu.memory_space<vmem>>, vector<1x32xf32>
    %62 = vector.shape_cast %61 : vector<1x32xf32> to vector<32xf32>
    %63 = vector.shape_cast %62 : vector<32xf32> to vector<1x32xf32>
    %64 = vector.broadcast %63 : vector<1x32xf32> to vector<8x32xf32>
    %65 = arith.addf %60, %64 : vector<8x32xf32>
    %c0_31 = arith.constant 0 : index
    %c0_32 = arith.constant 0 : index
    %66 = vector.load %arg11[%c0_31, %c0_32] : memref<1x32xf32, #tpu.memory_space<vmem>>, vector<1x32xf32>
    %67 = vector.shape_cast %66 : vector<1x32xf32> to vector<32xf32>
    %c0_33 = arith.constant 0 : index
    %c0_34 = arith.constant 0 : index
    %68 = vector.load %arg12[%c0_33, %c0_34] : memref<1x32xf32, #tpu.memory_space<vmem>>, vector<1x32xf32>
    %69 = vector.shape_cast %68 : vector<1x32xf32> to vector<32xf32>
    %cst_35 = arith.constant dense<0.000000e+00> : vector<8xf32>
    %70 = vector.multi_reduction <add>, %65, %cst_35 [1] : vector<8x32xf32> to vector<8xf32>
    %71 = vector.shape_cast %70 : vector<8xf32> to vector<8x1xf32>
    %cst_36 = arith.constant 3.200000e+01 : f32
    %72 = vector.broadcast %cst_36 : f32 to vector<8x1xf32>
    %73 = arith.divf %71, %72 : vector<8x1xf32>
    %74 = vector.broadcast %73 : vector<8x1xf32> to vector<8x32xf32>
    %75 = arith.subf %65, %74 : vector<8x32xf32>
    %76 = arith.mulf %75, %75 : vector<8x32xf32>
    %cst_37 = arith.constant dense<0.000000e+00> : vector<8xf32>
    %77 = vector.multi_reduction <add>, %76, %cst_37 [1] : vector<8x32xf32> to vector<8xf32>
    %78 = vector.shape_cast %77 : vector<8xf32> to vector<8x1xf32>
    %cst_38 = arith.constant 3.200000e+01 : f32
    %79 = vector.broadcast %cst_38 : f32 to vector<8x1xf32>
    %80 = arith.divf %78, %79 : vector<8x1xf32>
    %81 = vector.broadcast %73 : vector<8x1xf32> to vector<8x32xf32>
    %82 = arith.subf %65, %81 : vector<8x32xf32>
    %cst_39 = arith.constant 9.99999974E-6 : f32
    %83 = vector.broadcast %cst_39 : f32 to vector<8x1xf32>
    %84 = arith.addf %80, %83 : vector<8x1xf32>
    %85 = math.rsqrt %84 : vector<8x1xf32>
    %86 = vector.broadcast %85 : vector<8x1xf32> to vector<8x32xf32>
    %87 = arith.mulf %82, %86 : vector<8x32xf32>
    %88 = vector.shape_cast %67 : vector<32xf32> to vector<1x32xf32>
    %89 = vector.broadcast %88 : vector<1x32xf32> to vector<8x32xf32>
    %90 = arith.mulf %87, %89 : vector<8x32xf32>
    %91 = vector.shape_cast %69 : vector<32xf32> to vector<1x32xf32>
    %92 = vector.broadcast %91 : vector<1x32xf32> to vector<8x32xf32>
    %93 = arith.addf %90, %92 : vector<8x32xf32>
    %94 = arith.truncf %93 : vector<8x32xf32> to vector<8x32xbf16>
    %c0_40 = arith.constant 0 : index
    %c0_41 = arith.constant 0 : index
    %95 = vector.load %arg13[%c0_40, %c0_41] : memref<32x128xbf16, #tpu.memory_space<vmem>>, vector<32x128xbf16>
    %cst_42 = arith.constant dense<0.000000e+00> : vector<8x128xf32>
    %96 = tpu.matmul %94, %95, %cst_42 {dimension_numbers = #tpu.dot_dimension_numbers<[1], [0], [0], [1], [0, 0, 1, 1], [], []>} : vector<8x32xbf16>, vector<32x128xbf16>, vector<8x128xf32> -> vector<8x128xf32>
    %c0_43 = arith.constant 0 : index
    %c0_44 = arith.constant 0 : index
    %97 = vector.load %arg14[%c0_43, %c0_44] : memref<1x128xf32, #tpu.memory_space<vmem>>, vector<1x128xf32>
    %98 = vector.shape_cast %97 : vector<1x128xf32> to vector<128xf32>
    %99 = vector.shape_cast %98 : vector<128xf32> to vector<1x128xf32>
    %100 = vector.broadcast %99 : vector<1x128xf32> to vector<8x128xf32>
    %101 = arith.addf %96, %100 : vector<8x128xf32>
    %cst_45 = arith.constant 5.000000e-01 : f32
    %102 = vector.broadcast %cst_45 : f32 to vector<8x128xf32>
    %103 = arith.mulf %102, %101 : vector<8x128xf32>
    %cst_46 = arith.constant 4.471500e-02 : f32
    %104 = vector.broadcast %cst_46 : f32 to vector<8x128xf32>
    %105 = arith.mulf %104, %101 : vector<8x128xf32>
    %106 = arith.mulf %105, %101 : vector<8x128xf32>
    %107 = arith.mulf %106, %101 : vector<8x128xf32>
    %108 = arith.addf %101, %107 : vector<8x128xf32>
    %cst_47 = arith.constant 0.797884583 : f32
    %109 = vector.broadcast %cst_47 : f32 to vector<8x128xf32>
    %110 = arith.mulf %109, %108 : vector<8x128xf32>
    %111 = math.tanh %110 : vector<8x128xf32>
    %cst_48 = arith.constant 1.000000e+00 : f32
    %112 = vector.broadcast %cst_48 : f32 to vector<8x128xf32>
    %113 = arith.addf %112, %111 : vector<8x128xf32>
    %114 = arith.mulf %103, %113 : vector<8x128xf32>
    %115 = arith.truncf %114 : vector<8x128xf32> to vector<8x128xbf16>
    %c0_49 = arith.constant 0 : index
    %c0_50 = arith.constant 0 : index
    %116 = vector.load %arg15[%c0_49, %c0_50] : memref<128x32xbf16, #tpu.memory_space<vmem>>, vector<128x32xbf16>
    %cst_51 = arith.constant dense<0.000000e+00> : vector<8x32xf32>
    %117 = tpu.matmul %115, %116, %cst_51 {dimension_numbers = #tpu.dot_dimension_numbers<[1], [0], [0], [1], [0, 0, 1, 1], [], []>} : vector<8x128xbf16>, vector<128x32xbf16>, vector<8x32xf32> -> vector<8x32xf32>
    %c0_52 = arith.constant 0 : index
    %c0_53 = arith.constant 0 : index
    %118 = vector.load %arg16[%c0_52, %c0_53] : memref<1x32xf32, #tpu.memory_space<vmem>>, vector<1x32xf32>
    %119 = vector.shape_cast %118 : vector<1x32xf32> to vector<32xf32>
    %120 = vector.shape_cast %119 : vector<32xf32> to vector<1x32xf32>
    %121 = vector.broadcast %120 : vector<1x32xf32> to vector<8x32xf32>
    %122 = arith.addf %117, %121 : vector<8x32xf32>
    %123 = arith.addf %65, %122 : vector<8x32xf32>
    %c0_54 = arith.constant 0 : index
    %c0_55 = arith.constant 0 : index
    %c0_56 = arith.constant 0 : index
    %124 = vector.load %arg17[%c0_54, %c0_55, %c0_56] : memref<1x8x32xf32, #tpu.memory_space<vmem>>, vector<1x8x32xf32>
    %125 = vector.shape_cast %124 : vector<1x8x32xf32> to vector<8x32xf32>
    %126 = vector.shape_cast %123 : vector<8x32xf32> to vector<1x8x32xf32>
    tpu.vector_store %arg17[%c0_54, %c0_55, %c0_56], %126 {strides = array<i32>} : memref<1x8x32xf32, #tpu.memory_space<vmem>>, vector<1x8x32xf32>,
    return
  }
  func.func @transform_0(%arg0: i32, %arg1: i32) -> (i32, i32, i32) {
    %c0_i32 = arith.constant 0 : i32
    %c0_i32_0 = arith.constant 0 : i32
    return %arg0, %arg1, %c0_i32 : i32, i32, i32
  }
  func.func @transform_1(%arg0: i32, %arg1: i32) -> (i32, i32, i32) {
    %c0_i32 = arith.constant 0 : i32
    %c0_i32_0 = arith.constant 0 : i32
    %c0_i32_1 = arith.constant 0 : i32
    return %arg0, %c0_i32, %c0_i32_0 : i32, i32, i32
  }
  func.func @transform_2(%arg0: i32, %arg1: i32) -> (i32, i32, i32) {
    %c0_i32 = arith.constant 0 : i32
    %c0_i32_0 = arith.constant 0 : i32
    %c0_i32_1 = arith.constant 0 : i32
    return %arg0, %c0_i32, %c0_i32_0 : i32, i32, i32
  }
  func.func @transform_3(%arg0: i32, %arg1: i32) -> (i32, i32) {
    %c0_i32 = arith.constant 0 : i32
    %c0_i32_0 = arith.constant 0 : i32
    %c0_i32_1 = arith.constant 0 : i32
    return %c0_i32, %c0_i32_0 : i32, i32
  }
  func.func @transform_4(%arg0: i32, %arg1: i32) -> (i32, i32) {
    %c0_i32 = arith.constant 0 : i32
    %c0_i32_0 = arith.constant 0 : i32
    %c0_i32_1 = arith.constant 0 : i32
    return %c0_i32, %c0_i32_0 : i32, i32
  }
  func.func @transform_5(%arg0: i32, %arg1: i32) -> (i32, i32) {
    %c0_i32 = arith.constant 0 : i32
    %c0_i32_0 = arith.constant 0 : i32
    %c0_i32_1 = arith.constant 0 : i32
    return %c0_i32, %c0_i32_0 : i32, i32
  }
  func.func @transform_6(%arg0: i32, %arg1: i32) -> (i32, i32) {
    %c0_i32 = arith.constant 0 : i32
    %c0_i32_0 = arith.constant 0 : i32
    %c0_i32_1 = arith.constant 0 : i32
    return %c0_i32, %c0_i32_0 : i32, i32
  }
  func.func @transform_7(%arg0: i32, %arg1: i32) -> (i32, i32) {
    %c0_i32 = arith.constant 0 : i32
    %c0_i32_0 = arith.constant 0 : i32
    %c0_i32_1 = arith.constant 0 : i32
    return %c0_i32, %c0_i32_0 : i32, i32
  }
  func.func @transform_8(%arg0: i32, %arg1: i32) -> (i32, i32) {
    %c0_i32 = arith.constant 0 : i32
    %c0_i32_0 = arith.constant 0 : i32
    %c0_i32_1 = arith.constant 0 : i32
    return %c0_i32, %c0_i32_0 : i32, i32
  }
  func.func @transform_9(%arg0: i32, %arg1: i32) -> (i32, i32) {
    %c0_i32 = arith.constant 0 : i32
    %c0_i32_0 = arith.constant 0 : i32
    %c0_i32_1 = arith.constant 0 : i32
    return %c0_i32, %c0_i32_0 : i32, i32
  }
  func.func @transform_10(%arg0: i32, %arg1: i32) -> (i32, i32) {
    %c0_i32 = arith.constant 0 : i32
    %c0_i32_0 = arith.constant 0 : i32
    %c0_i32_1 = arith.constant 0 : i32
    return %c0_i32, %c0_i32_0 : i32, i32
  }
  func.func @transform_11(%arg0: i32, %arg1: i32) -> (i32, i32) {
    %c0_i32 = arith.constant 0 : i32
    %c0_i32_0 = arith.constant 0 : i32
    %c0_i32_1 = arith.constant 0 : i32
    return %c0_i32, %c0_i32_0 : i32, i32
  }
  func.func @transform_12(%arg0: i32, %arg1: i32) -> (i32, i32) {
    %c0_i32 = arith.constant 0 : i32
    %c0_i32_0 = arith.constant 0 : i32
    %c0_i32_1 = arith.constant 0 : i32
    return %c0_i32, %c0_i32_0 : i32, i32
  }
  func.func @transform_13(%arg0: i32, %arg1: i32) -> (i32, i32) {
    %c0_i32 = arith.constant 0 : i32
    %c0_i32_0 = arith.constant 0 : i32
    %c0_i32_1 = arith.constant 0 : i32
    return %c0_i32, %c0_i32_0 : i32, i32
  }
  func.func @transform_14(%arg0: i32, %arg1: i32) -> (i32, i32) {
    %c0_i32 = arith.constant 0 : i32
    %c0_i32_0 = arith.constant 0 : i32
    %c0_i32_1 = arith.constant 0 : i32
    return %c0_i32, %c0_i32_0 : i32, i32
  }
  func.func @transform_15(%arg0: i32, %arg1: i32) -> (i32, i32, i32) {
    %c0_i32 = arith.constant 0 : i32
    %c0_i32_0 = arith.constant 0 : i32
    return %arg0, %arg1, %c0_i32 : i32, i32, i32
  }
}

module attributes {stable_mosaic.version = 11 : i64} {
  func.func @kernel(%arg0: i32, %arg1: i32, %arg2: memref<1x8x32xf32, #tpu.memory_space<vmem>>, %arg3: memref<1x32x16xbf16, #tpu.memory_space<vmem>>, %arg4: memref<1x16x32xbf16, #tpu.memory_space<vmem>>, %arg5: memref<1x32xf32, #tpu.memory_space<vmem>>, %arg6: memref<1x32xf32, #tpu.memory_space<vmem>>, %arg7: memref<32x32xbf16, #tpu.memory_space<vmem>>, %arg8: memref<1x32xf32, #tpu.memory_space<vmem>>, %arg9: memref<32x32xbf16, #tpu.memory_space<vmem>>, %arg10: memref<1x32xf32, #tpu.memory_space<vmem>>, %arg11: memref<1x32xf32, #tpu.memory_space<vmem>>, %arg12: memref<1x32xf32, #tpu.memory_space<vmem>>, %arg13: memref<32x128xbf16, #tpu.memory_space<vmem>>, %arg14: memref<1x128xf32, #tpu.memory_space<vmem>>, %arg15: memref<128x32xbf16, #tpu.memory_space<vmem>>, %arg16: memref<1x32xf32, #tpu.memory_space<vmem>>, %arg17: memref<1x8x32xf32, #tpu.memory_space<vmem>>) attributes {dimension_semantics = [#tpu.dimension_semantics<parallel>, #tpu.dimension_semantics<parallel>], iteration_bounds = array<i64: 2, 1>, scalar_prefetch = 0 : i64, scratch_operands = 0 : i64, tpu.core_type = #tpu.core_type<tc>, window_params = [{transform_indices = @transform_0, window_bounds = array<i64: 1, 8, 32>}, {transform_indices = @transform_1, window_bounds = array<i64: 1, 32, 16>}, {transform_indices = @transform_2, window_bounds = array<i64: 1, 16, 32>}, {pipeline_mode = #tpu.pipeline_mode<synchronous>, transform_indices = @transform_3, window_bounds = array<i64: 1, 32>}, {pipeline_mode = #tpu.pipeline_mode<synchronous>, transform_indices = @transform_4, window_bounds = array<i64: 1, 32>}, {pipeline_mode = #tpu.pipeline_mode<synchronous>, transform_indices = @transform_5, window_bounds = array<i64: 32, 32>}, {pipeline_mode = #tpu.pipeline_mode<synchronous>, transform_indices = @transform_6, window_bounds = array<i64: 1, 32>}, {pipeline_mode = #tpu.pipeline_mode<synchronous>, transform_indices = @transform_7, window_bounds = array<i64: 32, 32>}, {pipeline_mode = #tpu.pipeline_mode<synchronous>, transform_indices = @transform_8, window_bounds = array<i64: 1, 32>}, {pipeline_mode = #tpu.pipeline_mode<synchronous>, transform_indices = @transform_9, window_bounds = array<i64: 1, 32>}, {pipeline_mode = #tpu.pipeline_mode<synchronous>, transform_indices = @transform_10, window_bounds = array<i64: 1, 32>}, {pipeline_mode = #tpu.pipeline_mode<synchronous>, transform_indices = @transform_11, window_bounds = array<i64: 32, 128>}, {pipeline_mode = #tpu.pipeline_mode<synchronous>, transform_indices = @transform_12, window_bounds = array<i64: 1, 128>}, {pipeline_mode = #tpu.pipeline_mode<synchronous>, transform_indices = @transform_13, window_bounds = array<i64: 128, 32>}, {pipeline_mode = #tpu.pipeline_mode<synchronous>, transform_indices = @transform_14, window_bounds = array<i64: 1, 32>}, {transform_indices = @transform_15, window_bounds = array<i64: 1, 8, 32>}]} {
    %c0 = arith.constant 0 : index
    %c0_0 = arith.constant 0 : index
    %c0_1 = arith.constant 0 : index
    %0 = vector.load %arg2[%c0, %c0_0, %c0_1] : memref<1x8x32xf32, #tpu.memory_space<vmem>>, vector<1x8x32xf32>
    %1 = vector.shape_cast %0 : vector<1x8x32xf32> to vector<8x32xf32>
    %c0_2 = arith.constant 0 : index
    %c0_3 = arith.constant 0 : index
    %2 = vector.load %arg5[%c0_2, %c0_3] : memref<1x32xf32, #tpu.memory_space<vmem>>, vector<1x32xf32>
    %3 = vector.shape_cast %2 : vector<1x32xf32> to vector<32xf32>
    %c0_4 = arith.constant 0 : index
    %c0_5 = arith.constant 0 : index
    %4 = vector.load %arg6[%c0_4, %c0_5] : memref<1x32xf32, #tpu.memory_space<vmem>>, vector<1x32xf32>
    %5 = vector.shape_cast %4 : vector<1x32xf32> to vector<32xf32>
    %cst = arith.constant dense<0.000000e+00> : vector<8xf32>
    %6 = vector.multi_reduction <add>, %1, %cst [1] : vector<8x32xf32> to vector<8xf32>
    %7 = vector.shape_cast %6 : vector<8xf32> to vector<8x1xf32>
    %cst_6 = arith.constant 3.200000e+01 : f32
    %8 = vector.broadcast %cst_6 : f32 to vector<8x1xf32>
    %9 = arith.divf %7, %8 : vector<8x1xf32>
    %10 = vector.broadcast %9 : vector<8x1xf32> to vector<8x32xf32>
    %11 = arith.subf %1, %10 : vector<8x32xf32>
    %12 = arith.mulf %11, %11 : vector<8x32xf32>
    %cst_7 = arith.constant dense<0.000000e+00> : vector<8xf32>
    %13 = vector.multi_reduction <add>, %12, %cst_7 [1] : vector<8x32xf32> to vector<8xf32>
    %14 = vector.shape_cast %13 : vector<8xf32> to vector<8x1xf32>
    %cst_8 = arith.constant 3.200000e+01 : f32
    %15 = vector.broadcast %cst_8 : f32 to vector<8x1xf32>
    %16 = arith.divf %14, %15 : vector<8x1xf32>
    %17 = vector.broadcast %9 : vector<8x1xf32> to vector<8x32xf32>
    %18 = arith.subf %1, %17 : vector<8x32xf32>
    %cst_9 = arith.constant 9.99999974E-6 : f32
    %19 = vector.broadcast %cst_9 : f32 to vector<8x1xf32>
    %20 = arith.addf %16, %19 : vector<8x1xf32>
    %21 = math.rsqrt %20 : vector<8x1xf32>
    %22 = vector.broadcast %21 : vector<8x1xf32> to vector<8x32xf32>
    %23 = arith.mulf %18, %22 : vector<8x32xf32>
    %24 = vector.shape_cast %3 : vector<32xf32> to vector<1x32xf32>
    %25 = vector.broadcast %24 : vector<1x32xf32> to vector<8x32xf32>
    %26 = arith.mulf %23, %25 : vector<8x32xf32>
    %27 = vector.shape_cast %5 : vector<32xf32> to vector<1x32xf32>
    %28 = vector.broadcast %27 : vector<1x32xf32> to vector<8x32xf32>
    %29 = arith.addf %26, %28 : vector<8x32xf32>
    %30 = arith.truncf %29 : vector<8x32xf32> to vector<8x32xbf16>
    %c0_10 = arith.constant 0 : index
    %c0_11 = arith.constant 0 : index
    %31 = vector.load %arg7[%c0_10, %c0_11] : memref<32x32xbf16, #tpu.memory_space<vmem>>, vector<32x32xbf16>
    %cst_12 = arith.constant dense<0.000000e+00> : vector<8x32xf32>
    %32 = tpu.matmul %30, %31, %cst_12 {dimension_numbers = #tpu.dot_dimension_numbers<[1], [0], [0], [1], [0, 0, 1, 1], [], []>} : vector<8x32xbf16>, vector<32x32xbf16>, vector<8x32xf32> -> vector<8x32xf32>
    %33 = vector.shape_cast %32 : vector<8x32xf32> to vector<8x4x8xf32>
    %34 = arith.mulf %33, %33 : vector<8x4x8xf32>
    %cst_13 = arith.constant dense<0.000000e+00> : vector<8x4xf32>
    %35 = vector.multi_reduction <add>, %34, %cst_13 [2] : vector<8x4x8xf32> to vector<8x4xf32>
    %36 = vector.shape_cast %35 : vector<8x4xf32> to vector<8x4x1xf32>
    %cst_14 = arith.constant 1.000000e-24 : f32
    %37 = vector.broadcast %cst_14 : f32 to vector<8x4x1xf32>
    %38 = arith.maximumf %36, %37 : vector<8x4x1xf32>
    %39 = math.rsqrt %38 : vector<8x4x1xf32>
    %40 = vector.broadcast %39 : vector<8x4x1xf32> to vector<8x4x8xf32>
    %41 = arith.mulf %33, %40 : vector<8x4x8xf32>
    %42 = vector.shape_cast %41 : vector<8x4x8xf32> to vector<8x32xf32>
    %c0_15 = arith.constant 0 : index
    %c0_16 = arith.constant 0 : index
    %43 = vector.load %arg8[%c0_15, %c0_16] : memref<1x32xf32, #tpu.memory_space<vmem>>, vector<1x32xf32>
    %44 = vector.shape_cast %43 : vector<1x32xf32> to vector<32xf32>
    %45 = vector.shape_cast %44 : vector<32xf32> to vector<1x32xf32>
    %46 = vector.broadcast %45 : vector<1x32xf32> to vector<8x32xf32>
    %47 = arith.mulf %42, %46 : vector<8x32xf32>
    %48 = arith.truncf %47 : vector<8x32xf32> to vector<8x32xbf16>
    %c0_17 = arith.constant 0 : index
    %c0_18 = arith.constant 0 : index
    %c0_19 = arith.constant 0 : index
    %49 = vector.load %arg3[%c0_17, %c0_18, %c0_19] : memref<1x32x16xbf16, #tpu.memory_space<vmem>>, vector<1x32x16xbf16>
    %50 = vector.shape_cast %49 : vector<1x32x16xbf16> to vector<32x16xbf16>
    %cst_20 = arith.constant dense<0.000000e+00> : vector<8x16xf32>
    %51 = tpu.matmul %48, %50, %cst_20 {dimension_numbers = #tpu.dot_dimension_numbers<[1], [0], [0], [1], [0, 0, 1, 1], [], []>} : vector<8x32xbf16>, vector<32x16xbf16>, vector<8x16xf32> -> vector<8x16xf32>
    %cst_21 = arith.constant 0.000000e+00 : f32
    %52 = vector.broadcast %cst_21 : f32 to vector<8x16xf32>
    %53 = arith.maximumf %51, %52 : vector<8x16xf32>
    %54 = arith.truncf %53 : vector<8x16xf32> to vector<8x16xbf16>
    %c0_22 = arith.constant 0 : index
    %c0_23 = arith.constant 0 : index
    %c0_24 = arith.constant 0 : index
    %55 = vector.load %arg4[%c0_22, %c0_23, %c0_24] : memref<1x16x32xbf16, #tpu.memory_space<vmem>>, vector<1x16x32xbf16>
    %56 = vector.shape_cast %55 : vector<1x16x32xbf16> to vector<16x32xbf16>
    %cst_25 = arith.constant dense<0.000000e+00> : vector<8x32xf32>
    %57 = tpu.matmul %54, %56, %cst_25 {dimension_numbers = #tpu.dot_dimension_numbers<[1], [0], [0], [1], [0, 0, 1, 1], [], []>} : vector<8x16xbf16>, vector<16x32xbf16>, vector<8x32xf32> -> vector<8x32xf32>
    %58 = arith.truncf %57 : vector<8x32xf32> to vector<8x32xbf16>
    %c0_26 = arith.constant 0 : index
    %c0_27 = arith.constant 0 : index
    %59 = vector.load %arg9[%c0_26, %c0_27] : memref<32x32xbf16, #tpu.memory_space<vmem>>, vector<32x32xbf16>
    %cst_28 = arith.constant dense<0.000000e+00> : vector<8x32xf32>
    %60 = tpu.matmul %58, %59, %cst_28 {dimension_numbers = #tpu.dot_dimension_numbers<[1], [0], [0], [1], [0, 0, 1, 1], [], []>} : vector<8x32xbf16>, vector<32x32xbf16>, vector<8x32xf32> -> vector<8x32xf32>
    %c0_29 = arith.constant 0 : index
    %c0_30 = arith.constant 0 : index
    %61 = vector.load %arg10[%c0_29, %c0_30] : memref<1x32xf32, #tpu.memory_space<vmem>>, vector<1x32xf32>
    %62 = vector.shape_cast %61 : vector<1x32xf32> to vector<32xf32>
    %63 = vector.shape_cast %62 : vector<32xf32> to vector<1x32xf32>
    %64 = vector.broadcast %63 : vector<1x32xf32> to vector<8x32xf32>
    %65 = arith.addf %60, %64 : vector<8x32xf32>
    %c0_31 = arith.constant 0 : index
    %c0_32 = arith.constant 0 : index
    %66 = vector.load %arg11[%c0_31, %c0_32] : memref<1x32xf32, #tpu.memory_space<vmem>>, vector<1x32xf32>
    %67 = vector.shape_cast %66 : vector<1x32xf32> to vector<32xf32>
    %c0_33 = arith.constant 0 : index
    %c0_34 = arith.constant 0 : index
    %68 = vector.load %arg12[%c0_33, %c0_34] : memref<1x32xf32, #tpu.memory_space<vmem>>, vector<1x32xf32>
    %69 = vector.shape_cast %68 : vector<1x32xf32> to vector<32xf32>
    %cst_35 = arith.constant dense<0.000000e+00> : vector<8xf32>
    %70 = vector.multi_reduction <add>, %65, %cst_35 [1] : vector<8x32xf32> to vector<8xf32>
    %71 = vector.shape_cast %70 : vector<8xf32> to vector<8x1xf32>
    %cst_36 = arith.constant 3.200000e+01 : f32
    %72 = vector.broadcast %cst_36 : f32 to vector<8x1xf32>
    %73 = arith.divf %71, %72 : vector<8x1xf32>
    %74 = vector.broadcast %73 : vector<8x1xf32> to vector<8x32xf32>
    %75 = arith.subf %65, %74 : vector<8x32xf32>
    %76 = arith.mulf %75, %75 : vector<8x32xf32>
    %cst_37 = arith.constant dense<0.000000e+00> : vector<8xf32>
    %77 = vector.multi_reduction <add>, %76, %cst_37 [1] : vector<8x32xf32> to vector<8xf32>
    %78 = vector.shape_cast %77 : vector<8xf32> to vector<8x1xf32>
    %cst_38 = arith.constant 3.200000e+01 : f32
    %79 = vector.broadcast %cst_38 : f32 to vector<8x1xf32>
    %80 = arith.divf %78, %79 : vector<8x1xf32>
    %81 = vector.broadcast %73 : vector<8x1xf32> to vector<8x32xf32>
    %82 = arith.subf %65, %81 : vector<8x32xf32>
    %cst_39 = arith.constant 9.99999974E-6 : f32
    %83 = vector.broadcast %cst_39 : f32 to vector<8x1xf32>
    %84 = arith.addf %80, %83 : vector<8x1xf32>
    %85 = math.rsqrt %84 : vector<8x1xf32>
    %86 = vector.broadcast %85 : vector<8x1xf32> to vector<8x32xf32>
    %87 = arith.mulf %82, %86 : vector<8x32xf32>
    %88 = vector.shape_cast %67 : vector<32xf32> to vector<1x32xf32>
    %89 = vector.broadcast %88 : vector<1x32xf32> to vector<8x32xf32>
    %90 = arith.mulf %87, %89 : vector<8x32xf32>
    %91 = vector.shape_cast %69 : vector<32xf32> to vector<1x32xf32>
    %92 = vector.broadcast %91 : vector<1x32xf32> to vector<8x32xf32>
    %93 = arith.addf %90, %92 : vector<8x32xf32>
    %94 = arith.truncf %93 : vector<8x32xf32> to vector<8x32xbf16>
    %c0_40 = arith.constant 0 : index
    %c0_41 = arith.constant 0 : index
    %95 = vector.load %arg13[%c0_40, %c0_41] : memref<32x128xbf16, #tpu.memory_space<vmem>>, vector<32x128xbf16>
    %cst_42 = arith.constant dense<0.000000e+00> : vector<8x128xf32>
    %96 = tpu.matmul %94, %95, %cst_42 {dimension_numbers = #tpu.dot_dimension_numbers<[1], [0], [0], [1], [0, 0, 1, 1], [], []>} : vector<8x32xbf16>, vector<32x128xbf16>, vector<8x128xf32> -> vector<8x128xf32>
    %c0_43 = arith.constant 0 : index
    %c0_44 = arith.constant 0 : index
    %97 = vector.load %arg14[%c0_43, %c0_44] : memref<1x128xf32, #tpu.memory_space<vmem>>, vector<1x128xf32>
    %98 = vector.shape_cast %97 : vector<1x128xf32> to vector<128xf32>
    %99 = vector.shape_cast %98 : vector<128xf32> to vector<1x128xf32>
    %100 = vector.broadcast %99 : vector<1x128xf32> to vector<8x128xf32>
    %101 = arith.addf %96, %100 : vector<8x128xf32>
    %cst_45 = arith.constant 5.000000e-01 : f32
    %102 = vector.broadcast %cst_45 : f32 to vector<8x128xf32>
    %103 = arith.mulf %102, %101 : vector<8x128xf32>
    %cst_46 = arith.constant 4.471500e-02 : f32
    %104 = vector.broadcast %cst_46 : f32 to vector<8x128xf32>
    %105 = arith.mulf %104, %101 : vector<8x128xf32>
    %106 = arith.mulf %105, %101 : vector<8x128xf32>
    %107 = arith.mulf %106, %101 : vector<8x128xf32>
    %108 = arith.addf %101, %107 : vector<8x128xf32>
    %cst_47 = arith.constant 0.797884583 : f32
    %109 = vector.broadcast %cst_47 : f32 to vector<8x128xf32>
    %110 = arith.mulf %109, %108 : vector<8x128xf32>
    %111 = math.tanh %110 : vector<8x128xf32>
    %cst_48 = arith.constant 1.000000e+00 : f32
    %112 = vector.broadcast %cst_48 : f32 to vector<8x128xf32>
    %113 = arith.addf %112, %111 : vector<8x128xf32>
    %114 = arith.mulf %103, %113 : vector<8x128xf32>
    %115 = arith.truncf %114 : vector<8x128xf32> to vector<8x128xbf16>
    %c0_49 = arith.constant 0 : index
    %c0_50 = arith.constant 0 : index
    %116 = vector.load %arg15[%c0_49, %c0_50] : memref<128x32xbf16, #tpu.memory_space<vmem>>, vector<128x32xbf16>
    %cst_51 = arith.constant dense<0.000000e+00> : vector<8x32xf32>
    %117 = tpu.matmul %115, %116, %cst_51 {dimension_numbers = #tpu.dot_dimension_numbers<[1], [0], [0], [1], [0, 0, 1, 1], [], []>} : vector<8x128xbf16>, vector<128x32xbf16>, vector<8x32xf32> -> vector<8x32xf32>
    %c0_52 = arith.constant 0 : index
    %c0_53 = arith.constant 0 : index
    %118 = vector.load %arg16[%c0_52, %c0_53] : memref<1x32xf32, #tpu.memory_space<vmem>>, vector<1x32xf32>
    %119 = vector.shape_cast %118 : vector<1x32xf32> to vector<32xf32>
    %120 = vector.shape_cast %119 : vector<32xf32> to vector<1x32xf32>
    %121 = vector.broadcast %120 : vector<1x32xf32> to vector<8x32xf32>
    %122 = arith.addf %117, %121 : vector<8x32xf32>
    %123 = arith.addf %65, %122 : vector<8x32xf32>
    %c0_54 = arith.constant 0 : index
    %c0_55 = arith.constant 0 : index
    %c0_56 = arith.constant 0 : index
    %124 = vector.load %arg17[%c0_54, %c0_55, %c0_56] : memref<1x8x32xf32, #tpu.memory_space<vmem>>, vector<1x8x32xf32>
    %125 = vector.shape_cast %124 : vector<1x8x32xf32> to vector<8x32xf32>
    %126 = vector.shape_cast %123 : vector<8x32xf32> to vector<1x8x32xf32>
    tpu.vector_store %arg17[%c0_54, %c0_55, %c0_56], %126 {strides = array<i32>} : memref<1x8x32xf32, #tpu.memory_space<vmem>>, vector<1x8x32xf32>,
    return
  }
  func.func @transform_0(%arg0: i32, %arg1: i32) -> (i32, i32, i32) {
    %c0_i32 = arith.constant 0 : i32
    %c0_i32_0 = arith.constant 0 : i32
    return %arg0, %arg1, %c0_i32 : i32, i32, i32
  }
  func.func @transform_1(%arg0: i32, %arg1: i32) -> (i32, i32, i32) {
    %c0_i32 = arith.constant 0 : i32
    %c0_i32_0 = arith.constant 0 : i32
    %c0_i32_1 = arith.constant 0 : i32
    return %arg0, %c0_i32, %c0_i32_0 : i32, i32, i32
  }
  func.func @transform_2(%arg0: i32, %arg1: i32) -> (i32, i32, i32) {
    %c0_i32 = arith.constant 0 : i32
    %c0_i32_0 = arith.constant 0 : i32
    %c0_i32_1 = arith.constant 0 : i32
    return %arg0, %c0_i32, %c0_i32_0 : i32, i32, i32
  }
  func.func @transform_3(%arg0: i32, %arg1: i32) -> (i32, i32) {
    %c0_i32 = arith.constant 0 : i32
    %c0_i32_0 = arith.constant 0 : i32
    %c0_i32_1 = arith.constant 0 : i32
    return %c0_i32, %c0_i32_0 : i32, i32
  }
  func.func @transform_4(%arg0: i32, %arg1: i32) -> (i32, i32) {
    %c0_i32 = arith.constant 0 : i32
    %c0_i32_0 = arith.constant 0 : i32
    %c0_i32_1 = arith.constant 0 : i32
    return %c0_i32, %c0_i32_0 : i32, i32
  }
  func.func @transform_5(%arg0: i32, %arg1: i32) -> (i32, i32) {
    %c0_i32 = arith.constant 0 : i32
    %c0_i32_0 = arith.constant 0 : i32
    %c0_i32_1 = arith.constant 0 : i32
    return %c0_i32, %c0_i32_0 : i32, i32
  }
  func.func @transform_6(%arg0: i32, %arg1: i32) -> (i32, i32) {
    %c0_i32 = arith.constant 0 : i32
    %c0_i32_0 = arith.constant 0 : i32
    %c0_i32_1 = arith.constant 0 : i32
    return %c0_i32, %c0_i32_0 : i32, i32
  }
  func.func @transform_7(%arg0: i32, %arg1: i32) -> (i32, i32) {
    %c0_i32 = arith.constant 0 : i32
    %c0_i32_0 = arith.constant 0 : i32
    %c0_i32_1 = arith.constant 0 : i32
    return %c0_i32, %c0_i32_0 : i32, i32
  }
  func.func @transform_8(%arg0: i32, %arg1: i32) -> (i32, i32) {
    %c0_i32 = arith.constant 0 : i32
    %c0_i32_0 = arith.constant 0 : i32
    %c0_i32_1 = arith.constant 0 : i32
    return %c0_i32, %c0_i32_0 : i32, i32
  }
  func.func @transform_9(%arg0: i32, %arg1: i32) -> (i32, i32) {
    %c0_i32 = arith.constant 0 : i32
    %c0_i32_0 = arith.constant 0 : i32
    %c0_i32_1 = arith.constant 0 : i32
    return %c0_i32, %c0_i32_0 : i32, i32
  }
  func.func @transform_10(%arg0: i32, %arg1: i32) -> (i32, i32) {
    %c0_i32 = arith.constant 0 : i32
    %c0_i32_0 = arith.constant 0 : i32
    %c0_i32_1 = arith.constant 0 : i32
    return %c0_i32, %c0_i32_0 : i32, i32
  }
  func.func @transform_11(%arg0: i32, %arg1: i32) -> (i32, i32) {
    %c0_i32 = arith.constant 0 : i32
    %c0_i32_0 = arith.constant 0 : i32
    %c0_i32_1 = arith.constant 0 : i32
    return %c0_i32, %c0_i32_0 : i32, i32
  }
  func.func @transform_12(%arg0: i32, %arg1: i32) -> (i32, i32) {
    %c0_i32 = arith.constant 0 : i32
    %c0_i32_0 = arith.constant 0 : i32
    %c0_i32_1 = arith.constant 0 : i32
    return %c0_i32, %c0_i32_0 : i32, i32
  }
  func.func @transform_13(%arg0: i32, %arg1: i32) -> (i32, i32) {
    %c0_i32 = arith.constant 0 : i32
    %c0_i32_0 = arith.constant 0 : i32
    %c0_i32_1 = arith.constant 0 : i32
    return %c0_i32, %c0_i32_0 : i32, i32
  }
  func.func @transform_14(%arg0: i32, %arg1: i32) -> (i32, i32) {
    %c0_i32 = arith.constant 0 : i32
    %c0_i32_0 = arith.constant 0 : i32
    %c0_i32_1 = arith.constant 0 : i32
    return %c0_i32, %c0_i32_0 : i32, i32
  }
  func.func @transform_15(%arg0: i32, %arg1: i32) -> (i32, i32, i32) {
    %c0_i32 = arith.constant 0 : i32
    %c0_i32_0 = arith.constant 0 : i32
    return %arg0, %arg1, %c0_i32 : i32, i32, i32
  }
}

</mosaic_0001>

<bundles_post_ra>
// kernel: tpu_custom_call.1
= control target key start
LH: loop header
LB: loop body
LE: loop exit
PB: predicated region body
PF: predicated region fallthrough
CT: control target
= control target key end

     0   :  { %s2080_s0 = inlined_call_operand.vmem [shape: f32[2,8,32], index: 0, kind: input, shape index: {}]   ;;  %s2081_s1 = inlined_call_operand.vmem [shape: bf16[2,32,16], index: 1, kind: input, shape index: {}]   ;;  %s2082_s2 = inlined_call_operand.vmem [shape: bf16[2,16,32], index: 2, kind: input, shape index: {}]   ;;  %s2083_s3 = inlined_call_operand.vmem [shape: f32[1,32], index: 3, kind: input, shape index: {}]   ;;  %s2084_s4 = inlined_call_operand.vmem [shape: f32[1,32], index: 4, kind: input, shape index: {}]   ;;  %s2085_s5 = inlined_call_operand.vmem [shape: bf16[32,32], index: 5, kind: input, shape index: {}]   ;;  %s2086_s6 = inlined_call_operand.vmem [shape: f32[1,32], index: 6, kind: input, shape index: {}]   ;;  %s2087_s7 = inlined_call_operand.vmem [shape: bf16[32,32], index: 7, kind: input, shape index: {}]   ;;  %s2088_s8 = inlined_call_operand.vmem [shape: f32[1,32], index: 8, kind: input, shape index: {}]   ;;  %s2089_s9 = inlined_call_operand.vmem [shape: f32[1,32], index: 9, kind: input, shape index: {}]   ;;  %s2090_s10 = inlined_call_operand.vmem [shape: f32[1,32], index: 10, kind: input, shape index: {}]   ;;  %s2091_s11 = inlined_call_operand.vmem [shape: bf16[32,128], index: 11, kind: input, shape index: {}]   ;;  %s2092_s12 = inlined_call_operand.vmem [shape: f32[1,128], index: 12, kind: input, shape index: {}]   ;;  %s2093_s13 = inlined_call_operand.vmem [shape: bf16[128,32], index: 13, kind: input, shape index: {}]   ;;  %s2094_s14 = inlined_call_operand.vmem [shape: f32[1,32], index: 14, kind: input, shape index: {}]   ;;  %s2095_s15 = inlined_call_operand.hbm [shape: f32[2,8,32], index: 15, kind: output, shape index: {}]  }
   0x1   :  { %2102 = sst [smem:[#allocation11_spill]] %s2095_s15 }
   0x2   :  { %20 = vsyncpa [#allocation3], 0 }
   0x3   :  { %22 = vsyncpa [#allocation3 + $0x1], 0  ;;  %s1789_s18 = smov 0   ;;  %s1791_s19 = smov 0  }
   0x4   :  { %s1793_s20 = smov 0   ;;  %s1795_s21 = smov 0  }
   0x5   :  { %s1797_s22 = smov 0   ;;  %s1799_s23 = smov 0  }
   0x6 LB: > { %2103 = sst [smem:[#allocation5_spill]] %s1676_s18  ;;  %s1386_s24 = sadd.s32 4294967295, %s1696_s23   ;;  %s1696_s23 = sphi %s1799_s23, %s28_s23   ;;  %s1692_s22 = sphi %s1797_s22, %s2117_s22   ;;  %s1688_s21 = sphi %s1795_s21, %s2116_s21   ;;  %s1684_s20 = sphi %s1793_s20, %s2115_s20   ;;  %s1680_s19 = sphi %s1791_s19, %s2119_s19   ;;  %s1676_s18 = sphi %s1789_s18, %s2118_s18  }
   0x7   : > { %2104 = sst [smem:[#allocation6_spill]] %s1684_s20  ;;  %s1387_s25 = sadd.s32 4294967294, %s1696_s23  }
   0x8   : > { %2105 = sst [smem:[#allocation7_spill]] %s1692_s22  ;;  %s40_s26 = sadd.s32 1, %s1692_s22 }
   0x9   : > { %s381_s27 = sadd.s32 1, %s1684_s20  ;;  %p42_p0 = scmp.ge.s32.totalorder %s40_s26, 2 }
   0xa   : > { %p391_p1 = scmp.ne.s32.totalorder %s1684_s20, %s1680_s19  ;;  %p392_p2 = scmp.eq.s32.totalorder %s1386_s24, 1 }
   0xb   : > { %p397_p3 = scmp.ne.s32.totalorder %s1680_s19, %s1676_s18  ;;  %s2121_s26 = smov (%p42_p0, %s40_s26), 0 }
   0xc   : > { %2106 = sst [smem:[#allocation8_spill]] %s2121_s26  ;;  %p1829_p4 = por %p392_p2, %p391_p1 }
   0xd   : > { %p398_p5 = scmp.eq.s32.totalorder %s1387_s25, 1  ;;  %s376_s29 = ssub.s32 %s1692_s22, %s2121_s26 }
   0xe   : > { %p1390_p6 = scmp.ge.s32.totalorder %s1696_s23, 1  ;;  %p379_p7 = scmp.eq.s32.totalorder %s376_s29, 0 }
   0xf   : > { %p1836_p8 = por %p398_p5, %p397_p3  ;;  %p478_p9 = scmp.lt.s32.totalorder %s1696_s23, 3 }
  0x10   : > { %s1842_s16 = scalar_select %p379_p7, %s1684_s20, %s381_s27  }
  0x11   : > { %s2108_s30 = scalar_select %p1836_p8, 1, 0 }
  0x12   : > { %2110 = sst [smem:[#allocation10_spill]] %s1842_s16  ;;  %p479_p10 = pnand %p1390_p6, %p478_p9 }
  0x13   : > { %2109 = sst [smem:[#allocation9_spill]] %s2108_s30  ;;  %p538_p11 = scmp.lt.s32.totalorder (!%p479_p10), %s1688_s21, 1  ;;  %vm559_vm0 = vcmask (!%p479_p10), 261120   ;;  %v1580_v7 = vld [vmem:[%s2085_s5] sm:$0xff] (!%p479_p10)   ;;  %v1698_v8 = vmov (!%p479_p10), 0.0   ;;  %vm1699_vm1 = vmmov (!%p479_p10), 0   ;;  %v663_v26 = vlaneseq (!%p479_p10) }
  0x14   : > { %482 = sbr.rel (%p479_p10) target bundleno = 2430 (0x97e), region = 80  ;;  %1456 = vmatprep.subr.bf16.mxu0 (!%p479_p10), %v1698_v8  ;;  %1460 = vmatprep.mubr.msk.bf16.mxu0 (!%p479_p10), %vm1699_vm1, %v1698_v8  ;;  %v1581_v9 = vld [vmem:[%s2085_s5 + $0x8] sm:$0xff] (!%p479_p10)   ;;  %v1397_v14 = vld [vmem:[%s2083_s3] ss:$0 sm:$0xff] (!%p479_p10)  ;;  %s1701_s27 = smov (!%p479_p10), 120   ;;  %vm734_vm2 = vcmask (!%p479_p10), 60416  }
  0x15   : > { %1457 = vmatpush3.bf16.msra.mxu0 (!%p479_p10), %v1580_v7  ;;  %1478 = vmatprep.subr.bf16.mxu1 (!%p479_p10), %v1698_v8  ;;  %v1398_v16 = vld [vmem:[%s2084_s4] ss:$0 sm:$0xff] (!%p479_p10)  ;;  %s1702_s26 = smov (!%p479_p10), 112   ;;  %v1703_v24 = vmov (!%p479_p10), 1983009808   ;;  %v664_v30 = vshrl.u32 (!%p479_p10), %v663_v26, 7 }
  0x16   : > { %1458 = vmatprep.subr.bf16.mxu0 (!%p479_p10), %v1698_v8  ;;  %1482 = vmatprep.mubr.msk.bf16.mxu1 (!%p479_p10), %vm1699_vm1, %v1698_v8  ;;  %v661_v25 = vunpack.c.l.s4 (!%p479_p10), %v1703_v24  ;;  %v1704_v27 = vmov (!%p479_p10), 1934713408   ;;  %s1705_s15 = smov (!%p479_p10), 16   ;;  %vm863_vm3 = vcmask (!%p479_p10), 64512   ;;  %vm865_vm4 = vcmask (!%p479_p10), 130048  }
  0x17   : > { %v693_v28 = vunpack.c.l.s4 (!%p479_p10), %v1704_v27  ;;  %vm867_vm5 = vcmask (!%p479_p10), 195584  }
  0x18   : > { %v662_v29 = vunpack.c.0.s8 (!%p479_p10), %v661_v25 }
  0x19   : > { %1459 = vmatpush3.bf16.msra.mxu0 (!%p479_p10), %v1581_v9  ;;  %v694_v33 = vunpack.c.0.s8 (!%p479_p10), %v693_v28 }
  0x1a   : > { %1464 = vmatprep.subr.bf16.mxu0 (!%p479_p10), %v1698_v8  ;;  %v1884_v34 = vsub.s32 (!%p479_p10), %v662_v29, %v664_v30 }
  0x1b   : > { %s539_s17 = scalar_select %p538_p11, %s1688_s21, 1  ;;  %v1886_v40 = vsub.s32 %v694_v33, %v664_v30 }
  0x1d   : > { %s1392_s24 = sshll.u32 %s539_s17, 3  ;;  %s1431_s18 = sshll.u32 %s539_s17, 4 }
  0x1e   : > { %s544_s29 = scalar_lea.vmem %s2080_s0, %s1392_s24  ;;  %s1852_s30 = scalar_lea.vmem %s2081_s1, %s1431_s18 }
  0x1f   : > { %s1857_s20 = scalar_lea.vmem %s2082_s2, %s1392_s24  ;;  %v556_v0 = vld [vmem:[%s544_s29] sm:$0xff]  ;;  %s1700_s29 = smov 104  }
  0x20   : > { %v560_v1 = vsel %vm559_vm0, %v556_v0, 0.0  ;;  %s1706_s18 = smov 8   ;;  %s1428_s17 = sshll.u32 %s1688_s21, 7 }
  0x21   : > { %561 = vadd.xlane.f32.xlu0 %v560_v1 }
  0xae   : > { %v562_v2 = vpop.xlane.xlu0 %561 }
  0xaf   : > { %v564_v3 = vmul.f32 0.03125, %v562_v2 }
  0xb1   : > { %v565_v4 = vsub.f32 %v556_v0, %v564_v3 }
  0xb3   : > { %v566_v5 = vmul.f32 %v565_v4, %v565_v4 }
  0xb5   : > { %v567_v6 = vsel %vm559_vm0, %v566_v5, 0.0 }
  0xb6   : > { %568 = vadd.xlane.f32.xlu0 %v567_v6 }
 0x143   : > { %v569_v10 = vpop.xlane.xlu0 %568 }
 0x144   : > { %v570_v11 = vmul.f32 0.03125, %v569_v10 }
 0x146   : > { %v571_v12 = vadd.f32 1e-05, %v570_v11 }
 0x148   : > { %1596 = vrsqrt.f32 %v571_v12 }
 0x152   : > { %v1597_v13 = vpop.eup %1596 }
 0x153   : > { %v573_v15 = vmul.f32 %v1597_v13, %v565_v4 }
 0x155   : > { %v580_v17 = vmul.f32 %v1397_v14, %v573_v15 }
 0x157   : > { %v587_v18 = vadd.f32 %v1398_v16, %v580_v17 }
 0x159   : > { %v588_v19 = vpack.c.bf16 %v587_v18, %v587_v18 }
 0x15b   : > { %1461 = vmatmul.mubr.msk.bf16.vlgmr.msra.gmra.mrb[0].mxu0 %vm559_vm0, %v588_v19 }
 0x15c   : > { %1468 = vmatprep.mubr.msk.bf16.mxu0 %vm1699_vm1, %v1698_v8 }
 0x22e   : > { %v642_v20 = vpop.f32.mrb[0].mxu0 }
 0x22f   : > { %655 = vrot.lane.b32.xlu0 %v642_v20, %s1700_s29  ;;  %649 = vrot.lane.b32.xlu1 %v642_v20, %s1701_s27  ;;  %v1462_v21 = vpop.f32.mrb[1].mxu0  ;;  %s2111_s27 = sld [smem:[#allocation11_spill]] }
 0x230   : > { %v645_v22 = vpop.f32.mrb[2].mxu0 }
 0x231   : > { %v1463_v23 = vpop.f32.mrb[3].mxu0 }
 0x233   : > { %652 = vrot.lane.b32.xlu1 %v642_v20, %s1702_s26 }
 0x235   : > { %s2032_s26 = scalar_lea.hbm %s2111_s27, %s1428_s17 }
 0x2a1   : > { %v656_v31 = vpop.permute.xlu0 %655  ;;  %v650_v32 = vpop.permute.xlu1 %649 }
 0x2a2   : > { %v674_v35 = vcombine.low %v650_v32, %v656_v31  ;;  %v675_v36 = vcombine.high %v650_v32, %v656_v31 }
 0x2a4   : > { %v682_v41 = vrot.slane %v674_v35, %v1884_v34  ;;  %v689_v42 = vrot.slane %v675_v36, %v1884_v34 }
 0x2a5   : > { %v653_v37 = vpop.permute.xlu1 %652 }
 0x2a6   : > { %v658_v38 = vcombine.low %v642_v20, %v653_v37  ;;  %v659_v39 = vcombine.high %v642_v20, %v653_v37 }
 0x2a8   : > { %v666_v43 = vrot.slane %v658_v38, %v1884_v34  ;;  %v673_v44 = vrot.slane %v659_v39, %v1884_v34 }
 0x2aa   : > { %v690_v45 = vcombine.low %v666_v43, %v682_v41  ;;  %v691_v46 = vcombine.high %v666_v43, %v682_v41  ;;  %v707_v47 = vcombine.high %v673_v44, %v689_v42  ;;  %v706_v48 = vcombine.low %v673_v44, %v689_v42  ;;  %v1582_v44 = vld [vmem:[%s1852_s30] sm:$0xff]  }
 0x2ab   : > { %1465 = vmatpush3.bf16.msra.mxu0 %v1582_v44 }
 0x2ac   : > { %v1893_v49 = vrot.slane %v707_v47, %v1886_v40  ;;  %v1896_v50 = vrot.slane %v690_v45, %v1886_v40  ;;  %v705_v51 = vrot.slane %v691_v46, %v1886_v40  ;;  %v1909_v58 = vrot.slane %v706_v48, %v1886_v40  ;;  %1466 = vmatprep.subr.bf16.mxu0 %v1698_v8 }
 0x2ae   : > { %v726_v52 = vmul.f32 %v1896_v50, %v1896_v50  ;;  %v722_v53 = vcombine.high %v1896_v50, %v1698_v8  ;;  %v1905_v54 = vcombine.high %v1893_v49, %v1698_v8  ;;  %v728_v57 = vmul.f32 %v705_v51, %v705_v51 }
 0x2af   : > { %v730_v62 = vmul.f32 %v1909_v58, %v1909_v58  ;;  %v723_v63 = vcombine.high %v705_v51, %v1698_v8  ;;  %v724_v3 = vcombine.high %v1909_v58, %v1698_v8  ;;  %v732_v7 = vmul.f32 %v1893_v49, %v1893_v49 }
 0x2b0   : > { %v735_v55 = vsel %vm734_vm2, %v726_v52, 0.0  ;;  %v727_v56 = vmul.f32 %v722_v53, %v722_v53  ;;  %v733_v60 = vmul.f32 %v1905_v54, %v1905_v54  ;;  %v741_v61 = vsel %vm734_vm2, %v728_v57, 0.0 }
 0x2b1   : > { %736 = vadd.xlane.f32.xlu1 %v735_v55  ;;  %v747_v1 = vsel %vm734_vm2, %v730_v62, 0.0  ;;  %v729_v2 = vmul.f32 %v723_v63, %v723_v63  ;;  %v731_v5 = vmul.f32 %v724_v3, %v724_v3  ;;  %v753_v9 = vsel %vm734_vm2, %v732_v7, 0.0 }
 0x2b2   : > { %v738_v59 = vsel %vm734_vm2, %v727_v56, 0.0  ;;  %v756_v0 = vsel %vm734_vm2, %v733_v60, 0.0  ;;  %v1583_v56 = vld [vmem:[%s1852_s30 + $0x8] sm:$0xff]   ;;  %s1707_s30 = smov 24  }
 0x2b3   : > { %739 = vadd.xlane.f32.xlu0 %v738_v59  ;;  %v744_v4 = vsel %vm734_vm2, %v729_v2, 0.0  ;;  %v750_v6 = vsel %vm734_vm2, %v731_v5, 0.0  ;;  %1467 = vmatpush3.bf16.msra.mxu0 %v1583_v56  ;;  %v1593_v56 = vld [vmem:[%s2093_s13 + $0x28] sm:$0xff]  }
 0x2b4   : > { %1472 = vmatprep.subr.bf16.mxu0 %v1698_v8 }
 0x2b5   : > { %742 = vadd.xlane.f32.xlu1 %v741_v61 }
 0x2b7   : > { %757 = vadd.xlane.f32.xlu0 %v756_v0 }
 0x2b9   : > { %748 = vadd.xlane.f32.xlu1 %v747_v1 }
 0x2bd   : > { %745 = vadd.xlane.f32.xlu1 %v744_v4 }
 0x2c1   : > { %751 = vadd.xlane.f32.xlu1 %v750_v6 }
 0x2c5   : > { %754 = vadd.xlane.f32.xlu1 %v753_v9  ;;  %v1579_v9 = vld [vmem:[%s1857_s20] sm:$0xff]  }
 0x33e   : > { %v737_v10 = vpop.xlane.xlu1 %736 }
 0x33f   : > { %v759_v18 = vmax.f32 %v737_v10, 1e-24 }
 0x340   : > { %v740_v12 = vpop.xlane.xlu0 %739 }
 0x341   : > { %v760_v14 = vmax.f32 %v740_v12, 1e-24 }
 0x342   : > { %v743_v11 = vpop.xlane.xlu1 %742 }
 0x343   : > { %v761_v15 = vmax.f32 %v743_v11, 1e-24  ;;  %1598 = vrsqrt.f32 %v760_v14  ;;  %v1584_v11 = vld [vmem:[%s2087_s7] sm:$0xff]  }
 0x344   : > { %v758_v16 = vpop.xlane.xlu0 %757  ;;  %1479 = vmatpush3.bf16.msra.mxu1 %v1584_v11 }
 0x345   : > { %1600 = vrsqrt.f32 %v761_v15  ;;  %v766_v20 = vmax.f32 %v758_v16, 1e-24  ;;  %1480 = vmatprep.subr.bf16.mxu1 %v1698_v8 }
 0x346   : > { %v749_v13 = vpop.xlane.xlu1 %748 }
 0x347   : > { %v763_v22 = vmax.f32 %v749_v13, 1e-24 }
 0x34a   : > { %v746_v17 = vpop.xlane.xlu1 %745 }
 0x34b   : > { %v762_v19 = vmax.f32 %v746_v17, 1e-24 }
 0x34d   : > { %1602 = vrsqrt.f32 %v762_v19  ;;  %v1599_v26 = vpop.eup %1598 }
 0x34e   : > { %v752_v21 = vpop.xlane.xlu1 %751  ;;  %1604 = vrsqrt.f32 %v759_v18  ;;  %v776_v32 = vmul.f32 %v1599_v26, %v722_v53  ;;  %v1585_v18 = vld [vmem:[%s2087_s7 + $0x8] sm:$0xff]  }
 0x34f   : > { %v764_v23 = vmax.f32 %v752_v21, 1e-24  ;;  %1606 = vrsqrt.f32 %v766_v20  ;;  %v1601_v27 = vpop.eup %1600  ;;  %1481 = vmatpush3.bf16.msra.mxu1 %v1585_v18 }
 0x350   : > { %v777_v33 = vmul.f32 %v1601_v27, %v705_v51  ;;  %1494 = vmatprep.subr.bf16.mxu1 %v1698_v8 }
 0x351   : > { %1608 = vrsqrt.f32 %v764_v23 }
 0x352   : > { %v755_v24 = vpop.xlane.xlu1 %754  ;;  %1610 = vrsqrt.f32 %v763_v22 }
 0x353   : > { %v765_v25 = vmax.f32 %v755_v24, 1e-24  ;;  %v1408_v24 = vld [vmem:[%s2088_s8] ss:$0 sm:$0xff] }
 0x355   : > { %1612 = vrsqrt.f32 %v765_v25 }
 0x357   : > { %v1603_v28 = vpop.eup %1602 }
 0x358   : > { %v778_v29 = vmul.f32 %v1603_v28, %v723_v63  ;;  %v1605_v30 = vpop.eup %1604 }
 0x359   : > { %v1607_v31 = vpop.eup %1606  ;;  %v775_v36 = vmul.f32 %v1605_v30, %v1896_v50 }
 0x35a   : > { %v791_v38 = vcombine.low %v776_v32, %v778_v29  ;;  %v782_v41 = vmul.f32 %v1607_v31, %v1905_v54 }
 0x35b   : > { %v1609_v35 = vpop.eup %1608  ;;  %v783_v42 = vcombine.low %v775_v36, %v777_v33 }
 0x35c   : > { %v780_v37 = vmul.f32 %v1609_v35, %v724_v3  ;;  %v1611_v39 = vpop.eup %1610  ;;  %v798_v47 = vrot.slane %v791_v38, %v1884_v34  ;;  %v1587_v38 = vld [vmem:[%s2091_s11 + $0x8] sm:$0xff]  }
 0x35d   : > { %v779_v45 = vmul.f32 %v1611_v39, %v1909_v58  ;;  %v790_v51 = vrot.slane %v783_v42, %v1884_v34  ;;  %v1588_v39 = vld [vmem:[%s2093_s13] sm:$0xff]  }
 0x35e   : > { %v807_v48 = vcombine.low %v780_v37, %v782_v41  ;;  %v1586_v37 = vld [vmem:[%s2091_s11] sm:$0xff]  }
 0x35f   : > { %v1613_v43 = vpop.eup %1612  ;;  %v816_v54 = vcombine.high %v790_v51, %v798_v47  ;;  %v815_v55 = vcombine.low %v790_v51, %v798_v47  ;;  %v1413_v47 = vld [vmem:[%s2090_s10] ss:$0 sm:$0xff] }
 0x360   : > { %v781_v46 = vmul.f32 %v1613_v43, %v1893_v49  ;;  %v814_v53 = vrot.slane %v807_v48, %v1884_v34 }
 0x361   : > { %v830_v49 = vrot.slane %v816_v54, %v1886_v40  ;;  %v823_v60 = vrot.slane %v815_v55, %v1886_v40  ;;  %v1591_v54 = vld [vmem:[%s2093_s13 + $0x18] sm:$0xff]   ;;  %v1592_v55 = vld [vmem:[%s2093_s13 + $0x20] sm:$0xff]  }
 0x362   : > { %v799_v50 = vcombine.low %v779_v45, %v781_v46  ;;  %v1412_v45 = vld [vmem:[%s2089_s9] ss:$0 sm:$0xff] }
 0x364   : > { %v806_v52 = vrot.slane %v799_v50, %v1884_v34 }
 0x366   : > { %v832_v57 = vcombine.high %v806_v52, %v814_v53  ;;  %v831_v58 = vcombine.low %v806_v52, %v814_v53  ;;  %v1589_v52 = vld [vmem:[%s2093_s13 + $0x8] sm:$0xff]   ;;  %v1590_v53 = vld [vmem:[%s2093_s13 + $0x10] sm:$0xff]  }
 0x368   : > { %v846_v59 = vrot.slane %v832_v57, %v1886_v40  ;;  %v839_v61 = vrot.slane %v831_v58, %v1886_v40  ;;  %v1402_v40 = vld [vmem:[%s2086_s6] ss:$0 sm:$0xff]  ;;  %v1594_v57 = vld [vmem:[%s2093_s13 + $0x30] sm:$0xff]   ;;  %v1595_v58 = vld [vmem:[%s2093_s13 + $0x38] sm:$0xff]  }
 0x36a   : > { %v849_v62 = vcombine.low %v830_v49, %v846_v59  ;;  %v848_v63 = vcombine.high %v823_v60, %v839_v61  ;;  %v847_v0 = vcombine.low %v823_v60, %v839_v61  ;;  %v850_v34 = vcombine.high %v830_v49, %v846_v59  ;;  %v1414_v49 = vld [vmem:[%s2092_s12] ss:$0 sm:$0xff] }
 0x36c   : > { %856 = vrot.lane.b32.xlu0 %v849_v62, %s1705_s15  ;;  %852 = vrot.lane.b32.xlu1 %v848_v63, %s1706_s18  ;;  %s535_s18 = sand.u32 1, %s1680_s19  }
 0x36d   : > { %s1277_s21 = scalar_lea.sflag [#allocation3], %s535_s18 }
 0x370   : > { %860 = vrot.lane.b32.xlu1 %v850_v34, %s1707_s30  ;;  %s1391_s30 = sshll.u32 %s535_s18, 3 }
 0x371   : > { %s537_s24 = scalar_lea.vmem [#allocation2], %s1391_s30  ;;  %s1708_s30 = smov [#allocation2]  }
 0x372   : > { %s1291_s20 = sshll.u32 %s537_s24, 4  ;;  %s1622_s22 = sshll.u32 %s1708_s30, 4  ;;  %s2034_s20 = int_to_ptr.vmem [resolvable:$true] %s1291_s20  ;;  %s1623_s22 = int_to_ptr.vmem [resolvable:$false] %s1622_s22 }
 0x373   : > { %s1618_s15 = scalar_lea.vmem %s2034_s20, 128  ;;  %s1624_s16 = scalar_lea.vmem %s1623_s22, 256 }
 0x374   : > { %p1619_p12 = scmp.ne.s32.totalorder %s2034_s20, %s1618_s15  ;;  %p1625_p1 = scmp.lt.s32.totalorder %s2034_s20, %s1623_s22 }
 0x375   : > { %p1626_p2 = scmp.lt.s32.totalorder %s1624_s16, %s1618_s15 }
 0x376   : > { %p1620_p13 = pnand %p1619_p12, %p1829_p4 }
 0x377   : > { %p1627_p3 = por %p1626_p2, %p1625_p1 }
 0x378   : > { %p1621_p0 = pneg %p1620_p13 }
 0x37a   : > { %p1628_p5 = pnand %p1627_p3, %p1621_p0 }
 0x3de   : > { %v853_v1 = vpop.permute.xlu1 %852  ;;  %v857_v2 = vpop.permute.xlu0 %856 }
 0x3df   : > { %v864_v3 = vsel %vm863_vm3, %v847_v0, %v853_v1 }
 0x3e0   : > { %v866_v5 = vsel %vm865_vm4, %v864_v3, %v857_v2 }
 0x3e2   : > { %v861_v4 = vpop.permute.xlu1 %860 }
 0x3e3   : > { %v868_v6 = vsel %vm867_vm5, %v866_v5, %v861_v4 }
 0x3e4   : > { %v876_v7 = vmul.f32 %v1402_v40, %v868_v6 }
 0x3e6   : > { %v877_v10 = vpack.c.bf16 %v876_v7, %v876_v7  ;;  %v1418_v7 = vld [vmem:[%s2094_s14] ss:$0 sm:$0xff] }
 0x3e8   : > { %1469 = vmatmul.mubr.msk.bf16.vlgmr.msra.gmra.mrb[4].mxu0 %vm559_vm0, %v877_v10 }
 0x3e9   : > { %1473 = vmatpush3.bf16.msra.mxu0 %v1579_v9  ;;  %1474 = vmatprep.mubr.msk.bf16.mxu0 %vm1699_vm1, %v1698_v8 }
 0x3ea   : > { %1486 = vmatprep.subr.bf16.mxu0 %v1698_v8 }
 0x4bb   : > { %v931_v12 = vpop.f32.mrb[4].mxu0 }
 0x4bc   : > { %v937_v13 = vmax.f32 %v931_v12, 0.0  ;;  %v1470_v14 = vpop.f32.mrb[5].mxu0 }
 0x4bd   : > { %v934_v15 = vpop.f32.mrb[6].mxu0 }
 0x4be   : > { %v938_v16 = vpack.c.bf16 %v937_v13, %v937_v13  ;;  %v1471_v17 = vpop.f32.mrb[7].mxu0 }
 0x4c0   : > { %1475 = vmatmul.mubr.msk.bf16.vlgmr.msra.gmra.mrb[8].mxu0 %vm865_vm4, %v938_v16 }
 0x4c1   : > { %1490 = vmatprep.mubr.msk.bf16.mxu0 %vm1699_vm1, %v1698_v8  ;;  %1487 = vmatpush3.bf16.msra.mxu0 %v1586_v37 }
 0x4c2   : > { %1488 = vmatprep.subr.bf16.mxu0 %v1698_v8 }
 0x4c5   : > { %1489 = vmatpush3.bf16.msra.mxu0 %v1587_v38 }
 0x593   : > { %v984_v19 = vpop.f32.mrb[8].mxu0 }
 0x594   : > { %v990_v20 = vpack.c.bf16 %v984_v19, %v984_v19  ;;  %v1476_v21 = vpop.f32.mrb[9].mxu0 }
 0x595   : > { %v987_v22 = vpop.f32.mrb[10].mxu0 }
 0x596   : > { %v1477_v23 = vpop.f32.mrb[11].mxu0  ;;  %1483 = vmatmul.mubr.msk.bf16.vlgmr.msra.gmra.mrb[0].mxu1 %vm559_vm0, %v990_v20 }
 0x597   : > { %1510 = vmatprep.mubr.msk.bf16.mxu1 %vm1699_vm1, %v1698_v8  ;;  %1495 = vmatpush3.bf16.msra.mxu1 %v1588_v39 }
 0x598   : > { %1496 = vmatprep.subr.bf16.mxu1 %v1698_v8 }
 0x59b   : > { %1497 = vmatpush3.bf16.msra.mxu1 %v1589_v52 }
 0x59c   : > { %1498 = vmatprep.subr.bf16.mxu1 %v1698_v8 }
 0x59f   : > { %1499 = vmatpush3.bf16.msra.mxu1 %v1590_v53 }
 0x5a0   : > { %1500 = vmatprep.subr.bf16.mxu1 %v1698_v8 }
 0x5a3   : > { %1501 = vmatpush3.bf16.msra.mxu1 %v1591_v54 }
 0x5a4   : > { %1502 = vmatprep.subr.bf16.mxu1 %v1698_v8 }
 0x5a7   : > { %1503 = vmatpush3.bf16.msra.mxu1 %v1592_v55 }
 0x5a8   : > { %1504 = vmatprep.subr.bf16.mxu1 %v1698_v8 }
 0x5ab   : > { %1505 = vmatpush3.bf16.msra.mxu1 %v1593_v56 }
 0x5ac   : > { %1506 = vmatprep.subr.bf16.mxu1 %v1698_v8 }
 0x5af   : > { %1507 = vmatpush3.bf16.msra.mxu1 %v1594_v57 }
 0x5b0   : > { %1508 = vmatprep.subr.bf16.mxu1 %v1698_v8 }
 0x5b3   : > { %1509 = vmatpush3.bf16.msra.mxu1 %v1595_v58 }
 0x669   : > { %v1051_v25 = vpop.f32.mrb[0].mxu1 }
 0x66a   : > { %v1969_v26 = vadd.f32 %v1408_v24, %v1051_v25  ;;  %v1484_v27 = vpop.f32.mrb[1].mxu1 }
 0x66b   : > { %v1054_v28 = vpop.f32.mrb[2].mxu1 }
 0x66c   : > { %v1485_v29 = vpop.f32.mrb[3].mxu1  ;;  %v1059_v30 = vsel %vm559_vm0, %v1969_v26, 0.0 }
 0x66d   : > { %1060 = vadd.xlane.f32.xlu1 %v1059_v30 }
 0x6fa   : > { %v1061_v31 = vpop.xlane.xlu1 %1060 }
 0x6fb   : > { %v1062_v32 = vmul.f32 0.03125, %v1061_v31 }
 0x6fd   : > { %v1063_v33 = vsub.f32 %v1969_v26, %v1062_v32 }
 0x6ff   : > { %v1064_v35 = vmul.f32 %v1063_v33, %v1063_v33 }
 0x701   : > { %v1065_v36 = vsel %vm559_vm0, %v1064_v35, 0.0 }
 0x702   : > { %1066 = vadd.xlane.f32.xlu0 %v1065_v36 }
 0x78f   : > { %v1067_v41 = vpop.xlane.xlu0 %1066 }
 0x790   : > { %v1068_v42 = vmul.f32 0.03125, %v1067_v41 }
 0x792   : > { %v1069_v43 = vadd.f32 1e-05, %v1068_v42 }
 0x794   : > { %1614 = vrsqrt.f32 %v1069_v43 }
 0x79e   : > { %v1615_v44 = vpop.eup %1614 }
 0x79f   : > { %v1071_v46 = vmul.f32 %v1615_v44, %v1063_v33 }
 0x7a1   : > { %v1078_v48 = vmul.f32 %v1412_v45, %v1071_v46 }
 0x7a3   : > { %v1085_v51 = vadd.f32 %v1413_v47, %v1078_v48 }
 0x7a5   : > { %v1086_v50 = vpack.c.bf16 %v1085_v51, %v1085_v51 }
 0x7a7   : > { %1491 = vmatmul.mubr.msk.bf16.vlgmr.msra.gmra.mrb[12].mxu0 %vm559_vm0, %v1086_v50 }
 0x87a   : > { %v1147_v59 = vpop.f32.mrb[12].mxu0 }
 0x87b   : > { %v1148_v60 = vadd.f32 %v1414_v49, %v1147_v59  ;;  %v1492_v61 = vpop.f32.mrb[13].mxu0 }
 0x87c   : > { %v1150_v62 = vpop.f32.mrb[14].mxu0 }
 0x87d   : > { %v1154_v63 = vmul.f32 0.044715, %v1148_v60  ;;  %v1493_v0 = vpop.f32.mrb[15].mxu0  ;;  %v1153_v8 = vmul.f32 0.5, %v1148_v60 }
 0x87f   : > { %v1155_v34 = vmul.f32 %v1154_v63, %v1148_v60 }
 0x881   : > { %v1156_v1 = vmul.f32 %v1155_v34, %v1148_v60 }
 0x883   : > { %v1157_v2 = vadd.f32 %v1156_v1, %v1148_v60 }
 0x885   : > { %v1158_v3 = vmul.f32 0.7978846, %v1157_v2 }
 0x887   : > { %1616 = vtanh.f32 %v1158_v3 }
 0x891   : > { %v1617_v40 = vpop.eup %1616 }
 0x892   : > { %v1160_v4 = vadd.f32 1.0, %v1617_v40 }
 0x894   : > { %v1161_v5 = vmul.f32 %v1160_v4, %v1153_v8 }
 0x896   : > { %v1162_v6 = vpack.c.bf16 %v1161_v5, %v1161_v5 }
 0x898   : > { %1511 = vmatmul.mubr.bf16.vlgmr.msra.gmra.mrb[4].mxu1 %v1162_v6 }
 0x96b   : > { %v1268_v9 = vpop.f32.mrb[4].mxu1 }
 0x96c   : > { %v1269_v10 = vadd.f32 %v1418_v7, %v1268_v9  ;;  %v1512_v11 = vpop.f32.mrb[5].mxu1 }
 0x96d   : > { %v1271_v12 = vpop.f32.mrb[6].mxu1 }
 0x96e   : > { %v1274_v13 = vadd.f32 %v1269_v10, %v1969_v26  ;;  %v1513_v14 = vpop.f32.mrb[7].mxu1 }
 0x970   : > { %1275 = vst.msk [vmem:[%s537_s24] sm:$0xff] %vm559_vm0, %v1274_v13 }
 0x971   : > { %1631 = shalt.err (!%p1628_p5)
}
 0x972   : > { %s1632_s18 = scalar_lea.hbm %s2032_s26, 128  ;;  %s1636_s25 = scalar_lea.hbm %s2111_s27, 256 }
 0x973   : > { %p1633_p6 = scmp.ne.s32.totalorder %s2032_s26, %s1632_s18  ;;  %p1637_p10 = scmp.lt.u32.totalorder %s2032_s26, %s2111_s27 }
 0x974   : > { %p1638_p11 = scmp.lt.u32.totalorder %s1636_s25, %s1632_s18  ;;  %p1640_p13 = scmp.lt.u32.totalorder %s1632_s18, %s2032_s26 }
 0x975   : > { %p1634_p7 = pnand %p1633_p6, %p1829_p4 }
 0x976   : > { %p1639_p12 = por %p1638_p11, %p1637_p10 }
 0x977   : > { %p1635_p9 = pneg %p1634_p7 }
 0x978   : > { %p1641_p0 = por %p1640_p13, %p1639_p12 }
 0x97a   : > { %p1642_p1 = pnand %p1641_p0, %p1635_p9 }
 0x97c   : > { %1645 = shalt.err (!%p1642_p1)
}
 0x97d   : > { %1514 = dma.vmem_to_hbm [thread:$0]  (%p1829_p4), %s2034_s20, 128, %s2032_s26, %s1277_s21  }
 0x97e PF: > { %s2112_s15 = sld [smem:[#allocation5_spill]]  ;;  %p1520_p2 = scmp.ge.s32.totalorder %s1696_s23, 2 }
 0x980   : > { %p1517_p3 = pnand %p1520_p2, %p1836_p8 }
 0x984   : > { %s1303_s16 = sand.u32 1, %s2112_s15  }
 0x985   : > { %s1304_s17 = scalar_lea.sflag [#allocation3], %s1303_s16 }
 0x986   : > { %1671 = dma.done.wait (!%p1517_p3), %s1304_s17, 128  }
 0x987   : > { %1673 = vsyncadd (!%p1517_p3), %s1304_s17, 4294967168  ;;  %s28_s23 = sadd.s32 1, %s1696_s23   ;;  %s2114_s24 = sld [smem:[#allocation6_spill]] }
 0x988   : > { %p25_p5 = scmp.ge.s32.totalorder %s28_s23, 4   ;;  %s2115_s20 = sld [smem:[#allocation10_spill]] }
 0x989   : > { %s2116_s21 = sld [smem:[#allocation7_spill]]  ;;  %s2117_s22 = sld [smem:[#allocation8_spill]] }
 0x98a   : > { %s2118_s18 = smov %s1680_s19  ;;  %27 = sbr.rel (!%p25_p5) target bundleno = 6 (0x6), region = 121 }
 0x98d   : > { %s2119_s19 = smov %s2114_s24 }
 0x991   :  { %1309 = vsyncpa [#allocation3], 1 }
 0x992   :  { %1311 = vsyncpa [#allocation3 + $0x1], 1 }

// kernel: tpu_custom_call.1
= control target key start
LH: loop header
LB: loop body
LE: loop exit
PB: predicated region body
PF: predicated region fallthrough
CT: control target
= control target key end

     0   :  { %s2080_s0 = inlined_call_operand.vmem [shape: f32[2,8,32], index: 0, kind: input, shape index: {}]   ;;  %s2081_s1 = inlined_call_operand.vmem [shape: bf16[2,32,16], index: 1, kind: input, shape index: {}]   ;;  %s2082_s2 = inlined_call_operand.vmem [shape: bf16[2,16,32], index: 2, kind: input, shape index: {}]   ;;  %s2083_s3 = inlined_call_operand.vmem [shape: f32[1,32], index: 3, kind: input, shape index: {}]   ;;  %s2084_s4 = inlined_call_operand.vmem [shape: f32[1,32], index: 4, kind: input, shape index: {}]   ;;  %s2085_s5 = inlined_call_operand.vmem [shape: bf16[32,32], index: 5, kind: input, shape index: {}]   ;;  %s2086_s6 = inlined_call_operand.vmem [shape: f32[1,32], index: 6, kind: input, shape index: {}]   ;;  %s2087_s7 = inlined_call_operand.vmem [shape: bf16[32,32], index: 7, kind: input, shape index: {}]   ;;  %s2088_s8 = inlined_call_operand.vmem [shape: f32[1,32], index: 8, kind: input, shape index: {}]   ;;  %s2089_s9 = inlined_call_operand.vmem [shape: f32[1,32], index: 9, kind: input, shape index: {}]   ;;  %s2090_s10 = inlined_call_operand.vmem [shape: f32[1,32], index: 10, kind: input, shape index: {}]   ;;  %s2091_s11 = inlined_call_operand.vmem [shape: bf16[32,128], index: 11, kind: input, shape index: {}]   ;;  %s2092_s12 = inlined_call_operand.vmem [shape: f32[1,128], index: 12, kind: input, shape index: {}]   ;;  %s2093_s13 = inlined_call_operand.vmem [shape: bf16[128,32], index: 13, kind: input, shape index: {}]   ;;  %s2094_s14 = inlined_call_operand.vmem [shape: f32[1,32], index: 14, kind: input, shape index: {}]   ;;  %s2095_s15 = inlined_call_operand.hbm [shape: f32[2,8,32], index: 15, kind: output, shape index: {}]  }
   0x1   :  { %2102 = sst [smem:[#allocation11_spill]] %s2095_s15 }
   0x2   :  { %20 = vsyncpa [#allocation3], 0 }
   0x3   :  { %22 = vsyncpa [#allocation3 + $0x1], 0  ;;  %s1789_s18 = smov 0   ;;  %s1791_s19 = smov 0  }
   0x4   :  { %s1793_s20 = smov 0   ;;  %s1795_s21 = smov 0  }
   0x5   :  { %s1797_s22 = smov 0   ;;  %s1799_s23 = smov 0  }
   0x6 LB: > { %2103 = sst [smem:[#allocation5_spill]] %s1676_s18  ;;  %s1386_s24 = sadd.s32 4294967295, %s1696_s23   ;;  %s1696_s23 = sphi %s1799_s23, %s28_s23   ;;  %s1692_s22 = sphi %s1797_s22, %s2117_s22   ;;  %s1688_s21 = sphi %s1795_s21, %s2116_s21   ;;  %s1684_s20 = sphi %s1793_s20, %s2115_s20   ;;  %s1680_s19 = sphi %s1791_s19, %s2119_s19   ;;  %s1676_s18 = sphi %s1789_s18, %s2118_s18  }
   0x7   : > { %2104 = sst [smem:[#allocation6_spill]] %s1684_s20  ;;  %s1387_s25 = sadd.s32 4294967294, %s1696_s23  }
   0x8   : > { %2105 = sst [smem:[#allocation7_spill]] %s1692_s22  ;;  %s40_s26 = sadd.s32 1, %s1692_s22 }
   0x9   : > { %s381_s27 = sadd.s32 1, %s1684_s20  ;;  %p42_p0 = scmp.ge.s32.totalorder %s40_s26, 2 }
   0xa   : > { %p391_p1 = scmp.ne.s32.totalorder %s1684_s20, %s1680_s19  ;;  %p392_p2 = scmp.eq.s32.totalorder %s1386_s24, 1 }
   0xb   : > { %p397_p3 = scmp.ne.s32.totalorder %s1680_s19, %s1676_s18  ;;  %s2121_s26 = smov (%p42_p0, %s40_s26), 0 }
   0xc   : > { %2106 = sst [smem:[#allocation8_spill]] %s2121_s26  ;;  %p1829_p4 = por %p392_p2, %p391_p1 }
   0xd   : > { %p398_p5 = scmp.eq.s32.totalorder %s1387_s25, 1  ;;  %s376_s29 = ssub.s32 %s1692_s22, %s2121_s26 }
   0xe   : > { %p1390_p6 = scmp.ge.s32.totalorder %s1696_s23, 1  ;;  %p379_p7 = scmp.eq.s32.totalorder %s376_s29, 0 }
   0xf   : > { %p1836_p8 = por %p398_p5, %p397_p3  ;;  %p478_p9 = scmp.lt.s32.totalorder %s1696_s23, 3 }
  0x10   : > { %s1842_s16 = scalar_select %p379_p7, %s1684_s20, %s381_s27  }
  0x11   : > { %s2108_s30 = scalar_select %p1836_p8, 1, 0 }
  0x12   : > { %2110 = sst [smem:[#allocation10_spill]] %s1842_s16  ;;  %p479_p10 = pnand %p1390_p6, %p478_p9 }
  0x13   : > { %2109 = sst [smem:[#allocation9_spill]] %s2108_s30  ;;  %p538_p11 = scmp.lt.s32.totalorder (!%p479_p10), %s1688_s21, 1  ;;  %vm559_vm0 = vcmask (!%p479_p10), 261120   ;;  %v1580_v7 = vld [vmem:[%s2085_s5] sm:$0xff] (!%p479_p10)   ;;  %v1698_v8 = vmov (!%p479_p10), 0.0   ;;  %vm1699_vm1 = vmmov (!%p479_p10), 0   ;;  %v663_v26 = vlaneseq (!%p479_p10) }
  0x14   : > { %482 = sbr.rel (%p479_p10) target bundleno = 2430 (0x97e), region = 80  ;;  %1456 = vmatprep.subr.bf16.mxu0 (!%p479_p10), %v1698_v8  ;;  %1460 = vmatprep.mubr.msk.bf16.mxu0 (!%p479_p10), %vm1699_vm1, %v1698_v8  ;;  %v1581_v9 = vld [vmem:[%s2085_s5 + $0x8] sm:$0xff] (!%p479_p10)   ;;  %v1397_v14 = vld [vmem:[%s2083_s3] ss:$0 sm:$0xff] (!%p479_p10)  ;;  %s1701_s27 = smov (!%p479_p10), 120   ;;  %vm734_vm2 = vcmask (!%p479_p10), 60416  }
  0x15   : > { %1457 = vmatpush3.bf16.msra.mxu0 (!%p479_p10), %v1580_v7  ;;  %1478 = vmatprep.subr.bf16.mxu1 (!%p479_p10), %v1698_v8  ;;  %v1398_v16 = vld [vmem:[%s2084_s4] ss:$0 sm:$0xff] (!%p479_p10)  ;;  %s1702_s26 = smov (!%p479_p10), 112   ;;  %v1703_v24 = vmov (!%p479_p10), 1983009808   ;;  %v664_v30 = vshrl.u32 (!%p479_p10), %v663_v26, 7 }
  0x16   : > { %1458 = vmatprep.subr.bf16.mxu0 (!%p479_p10), %v1698_v8  ;;  %1482 = vmatprep.mubr.msk.bf16.mxu1 (!%p479_p10), %vm1699_vm1, %v1698_v8  ;;  %v661_v25 = vunpack.c.l.s4 (!%p479_p10), %v1703_v24  ;;  %v1704_v27 = vmov (!%p479_p10), 1934713408   ;;  %s1705_s15 = smov (!%p479_p10), 16   ;;  %vm863_vm3 = vcmask (!%p479_p10), 64512   ;;  %vm865_vm4 = vcmask (!%p479_p10), 130048  }
  0x17   : > { %v693_v28 = vunpack.c.l.s4 (!%p479_p10), %v1704_v27  ;;  %vm867_vm5 = vcmask (!%p479_p10), 195584  }
  0x18   : > { %v662_v29 = vunpack.c.0.s8 (!%p479_p10), %v661_v25 }
  0x19   : > { %1459 = vmatpush3.bf16.msra.mxu0 (!%p479_p10), %v1581_v9  ;;  %v694_v33 = vunpack.c.0.s8 (!%p479_p10), %v693_v28 }
  0x1a   : > { %1464 = vmatprep.subr.bf16.mxu0 (!%p479_p10), %v1698_v8  ;;  %v1884_v34 = vsub.s32 (!%p479_p10), %v662_v29, %v664_v30 }
  0x1b   : > { %s539_s17 = scalar_select %p538_p11, %s1688_s21, 1  ;;  %v1886_v40 = vsub.s32 %v694_v33, %v664_v30 }
  0x1d   : > { %s1392_s24 = sshll.u32 %s539_s17, 3  ;;  %s1431_s18 = sshll.u32 %s539_s17, 4 }
  0x1e   : > { %s544_s29 = scalar_lea.vmem %s2080_s0, %s1392_s24  ;;  %s1852_s30 = scalar_lea.vmem %s2081_s1, %s1431_s18 }
  0x1f   : > { %s1857_s20 = scalar_lea.vmem %s2082_s2, %s1392_s24  ;;  %v556_v0 = vld [vmem:[%s544_s29] sm:$0xff]  ;;  %s1700_s29 = smov 104  }
  0x20   : > { %v560_v1 = vsel %vm559_vm0, %v556_v0, 0.0  ;;  %s1706_s18 = smov 8   ;;  %s1428_s17 = sshll.u32 %s1688_s21, 7 }
  0x21   : > { %561 = vadd.xlane.f32.xlu0 %v560_v1 }
  0xae   : > { %v562_v2 = vpop.xlane.xlu0 %561 }
  0xaf   : > { %v564_v3 = vmul.f32 0.03125, %v562_v2 }
  0xb1   : > { %v565_v4 = vsub.f32 %v556_v0, %v564_v3 }
  0xb3   : > { %v566_v5 = vmul.f32 %v565_v4, %v565_v4 }
  0xb5   : > { %v567_v6 = vsel %vm559_vm0, %v566_v5, 0.0 }
  0xb6   : > { %568 = vadd.xlane.f32.xlu0 %v567_v6 }
 0x143   : > { %v569_v10 = vpop.xlane.xlu0 %568 }
 0x144   : > { %v570_v11 = vmul.f32 0.03125, %v569_v10 }
 0x146   : > { %v571_v12 = vadd.f32 1e-05, %v570_v11 }
 0x148   : > { %1596 = vrsqrt.f32 %v571_v12 }
 0x152   : > { %v1597_v13 = vpop.eup %1596 }
 0x153   : > { %v573_v15 = vmul.f32 %v1597_v13, %v565_v4 }
 0x155   : > { %v580_v17 = vmul.f32 %v1397_v14, %v573_v15 }
 0x157   : > { %v587_v18 = vadd.f32 %v1398_v16, %v580_v17 }
 0x159   : > { %v588_v19 = vpack.c.bf16 %v587_v18, %v587_v18 }
 0x15b   : > { %1461 = vmatmul.mubr.msk.bf16.vlgmr.msra.gmra.mrb[0].mxu0 %vm559_vm0, %v588_v19 }
 0x15c   : > { %1468 = vmatprep.mubr.msk.bf16.mxu0 %vm1699_vm1, %v1698_v8 }
 0x22e   : > { %v642_v20 = vpop.f32.mrb[0].mxu0 }
 0x22f   : > { %655 = vrot.lane.b32.xlu0 %v642_v20, %s1700_s29  ;;  %649 = vrot.lane.b32.xlu1 %v642_v20, %s1701_s27  ;;  %v1462_v21 = vpop.f32.mrb[1].mxu0  ;;  %s2111_s27 = sld [smem:[#allocation11_spill]] }
 0x230   : > { %v645_v22 = vpop.f32.mrb[2].mxu0 }
 0x231   : > { %v1463_v23 = vpop.f32.mrb[3].mxu0 }
 0x233   : > { %652 = vrot.lane.b32.xlu1 %v642_v20, %s1702_s26 }
 0x235   : > { %s2032_s26 = scalar_lea.hbm %s2111_s27, %s1428_s17 }
 0x2a1   : > { %v656_v31 = vpop.permute.xlu0 %655  ;;  %v650_v32 = vpop.permute.xlu1 %649 }
 0x2a2   : > { %v674_v35 = vcombine.low %v650_v32, %v656_v31  ;;  %v675_v36 = vcombine.high %v650_v32, %v656_v31 }
 0x2a4   : > { %v682_v41 = vrot.slane %v674_v35, %v1884_v34  ;;  %v689_v42 = vrot.slane %v675_v36, %v1884_v34 }
 0x2a5   : > { %v653_v37 = vpop.permute.xlu1 %652 }
 0x2a6   : > { %v658_v38 = vcombine.low %v642_v20, %v653_v37  ;;  %v659_v39 = vcombine.high %v642_v20, %v653_v37 }
 0x2a8   : > { %v666_v43 = vrot.slane %v658_v38, %v1884_v34  ;;  %v673_v44 = vrot.slane %v659_v39, %v1884_v34 }
 0x2aa   : > { %v690_v45 = vcombine.low %v666_v43, %v682_v41  ;;  %v691_v46 = vcombine.high %v666_v43, %v682_v41  ;;  %v707_v47 = vcombine.high %v673_v44, %v689_v42  ;;  %v706_v48 = vcombine.low %v673_v44, %v689_v42  ;;  %v1582_v44 = vld [vmem:[%s1852_s30] sm:$0xff]  }
 0x2ab   : > { %1465 = vmatpush3.bf16.msra.mxu0 %v1582_v44 }
 0x2ac   : > { %v1893_v49 = vrot.slane %v707_v47, %v1886_v40  ;;  %v1896_v50 = vrot.slane %v690_v45, %v1886_v40  ;;  %v705_v51 = vrot.slane %v691_v46, %v1886_v40  ;;  %v1909_v58 = vrot.slane %v706_v48, %v1886_v40  ;;  %1466 = vmatprep.subr.bf16.mxu0 %v1698_v8 }
 0x2ae   : > { %v726_v52 = vmul.f32 %v1896_v50, %v1896_v50  ;;  %v722_v53 = vcombine.high %v1896_v50, %v1698_v8  ;;  %v1905_v54 = vcombine.high %v1893_v49, %v1698_v8  ;;  %v728_v57 = vmul.f32 %v705_v51, %v705_v51 }
 0x2af   : > { %v730_v62 = vmul.f32 %v1909_v58, %v1909_v58  ;;  %v723_v63 = vcombine.high %v705_v51, %v1698_v8  ;;  %v724_v3 = vcombine.high %v1909_v58, %v1698_v8  ;;  %v732_v7 = vmul.f32 %v1893_v49, %v1893_v49 }
 0x2b0   : > { %v735_v55 = vsel %vm734_vm2, %v726_v52, 0.0  ;;  %v727_v56 = vmul.f32 %v722_v53, %v722_v53  ;;  %v733_v60 = vmul.f32 %v1905_v54, %v1905_v54  ;;  %v741_v61 = vsel %vm734_vm2, %v728_v57, 0.0 }
 0x2b1   : > { %736 = vadd.xlane.f32.xlu1 %v735_v55  ;;  %v747_v1 = vsel %vm734_vm2, %v730_v62, 0.0  ;;  %v729_v2 = vmul.f32 %v723_v63, %v723_v63  ;;  %v731_v5 = vmul.f32 %v724_v3, %v724_v3  ;;  %v753_v9 = vsel %vm734_vm2, %v732_v7, 0.0 }
 0x2b2   : > { %v738_v59 = vsel %vm734_vm2, %v727_v56, 0.0  ;;  %v756_v0 = vsel %vm734_vm2, %v733_v60, 0.0  ;;  %v1583_v56 = vld [vmem:[%s1852_s30 + $0x8] sm:$0xff]   ;;  %s1707_s30 = smov 24  }
 0x2b3   : > { %739 = vadd.xlane.f32.xlu0 %v738_v59  ;;  %v744_v4 = vsel %vm734_vm2, %v729_v2, 0.0  ;;  %v750_v6 = vsel %vm734_vm2, %v731_v5, 0.0  ;;  %1467 = vmatpush3.bf16.msra.mxu0 %v1583_v56  ;;  %v1593_v56 = vld [vmem:[%s2093_s13 + $0x28] sm:$0xff]  }
 0x2b4   : > { %1472 = vmatprep.subr.bf16.mxu0 %v1698_v8 }
 0x2b5   : > { %742 = vadd.xlane.f32.xlu1 %v741_v61 }
 0x2b7   : > { %757 = vadd.xlane.f32.xlu0 %v756_v0 }
 0x2b9   : > { %748 = vadd.xlane.f32.xlu1 %v747_v1 }
 0x2bd   : > { %745 = vadd.xlane.f32.xlu1 %v744_v4 }
 0x2c1   : > { %751 = vadd.xlane.f32.xlu1 %v750_v6 }
 0x2c5   : > { %754 = vadd.xlane.f32.xlu1 %v753_v9  ;;  %v1579_v9 = vld [vmem:[%s1857_s20] sm:$0xff]  }
 0x33e   : > { %v737_v10 = vpop.xlane.xlu1 %736 }
 0x33f   : > { %v759_v18 = vmax.f32 %v737_v10, 1e-24 }
 0x340   : > { %v740_v12 = vpop.xlane.xlu0 %739 }
 0x341   : > { %v760_v14 = vmax.f32 %v740_v12, 1e-24 }
 0x342   : > { %v743_v11 = vpop.xlane.xlu1 %742 }
 0x343   : > { %v761_v15 = vmax.f32 %v743_v11, 1e-24  ;;  %1598 = vrsqrt.f32 %v760_v14  ;;  %v1584_v11 = vld [vmem:[%s2087_s7] sm:$0xff]  }
 0x344   : > { %v758_v16 = vpop.xlane.xlu0 %757  ;;  %1479 = vmatpush3.bf16.msra.mxu1 %v1584_v11 }
 0x345   : > { %1600 = vrsqrt.f32 %v761_v15  ;;  %v766_v20 = vmax.f32 %v758_v16, 1e-24  ;;  %1480 = vmatprep.subr.bf16.mxu1 %v1698_v8 }
 0x346   : > { %v749_v13 = vpop.xlane.xlu1 %748 }
 0x347   : > { %v763_v22 = vmax.f32 %v749_v13, 1e-24 }
 0x34a   : > { %v746_v17 = vpop.xlane.xlu1 %745 }
 0x34b   : > { %v762_v19 = vmax.f32 %v746_v17, 1e-24 }
 0x34d   : > { %1602 = vrsqrt.f32 %v762_v19  ;;  %v1599_v26 = vpop.eup %1598 }
 0x34e   : > { %v752_v21 = vpop.xlane.xlu1 %751  ;;  %1604 = vrsqrt.f32 %v759_v18  ;;  %v776_v32 = vmul.f32 %v1599_v26, %v722_v53  ;;  %v1585_v18 = vld [vmem:[%s2087_s7 + $0x8] sm:$0xff]  }
 0x34f   : > { %v764_v23 = vmax.f32 %v752_v21, 1e-24  ;;  %1606 = vrsqrt.f32 %v766_v20  ;;  %v1601_v27 = vpop.eup %1600  ;;  %1481 = vmatpush3.bf16.msra.mxu1 %v1585_v18 }
 0x350   : > { %v777_v33 = vmul.f32 %v1601_v27, %v705_v51  ;;  %1494 = vmatprep.subr.bf16.mxu1 %v1698_v8 }
 0x351   : > { %1608 = vrsqrt.f32 %v764_v23 }
 0x352   : > { %v755_v24 = vpop.xlane.xlu1 %754  ;;  %1610 = vrsqrt.f32 %v763_v22 }
 0x353   : > { %v765_v25 = vmax.f32 %v755_v24, 1e-24  ;;  %v1408_v24 = vld [vmem:[%s2088_s8] ss:$0 sm:$0xff] }
 0x355   : > { %1612 = vrsqrt.f32 %v765_v25 }
 0x357   : > { %v1603_v28 = vpop.eup %1602 }
 0x358   : > { %v778_v29 = vmul.f32 %v1603_v28, %v723_v63  ;;  %v1605_v30 = vpop.eup %1604 }
 0x359   : > { %v1607_v31 = vpop.eup %1606  ;;  %v775_v36 = vmul.f32 %v1605_v30, %v1896_v50 }
 0x35a   : > { %v791_v38 = vcombine.low %v776_v32, %v778_v29  ;;  %v782_v41 = vmul.f32 %v1607_v31, %v1905_v54 }
 0x35b   : > { %v1609_v35 = vpop.eup %1608  ;;  %v783_v42 = vcombine.low %v775_v36, %v777_v33 }
 0x35c   : > { %v780_v37 = vmul.f32 %v1609_v35, %v724_v3  ;;  %v1611_v39 = vpop.eup %1610  ;;  %v798_v47 = vrot.slane %v791_v38, %v1884_v34  ;;  %v1587_v38 = vld [vmem:[%s2091_s11 + $0x8] sm:$0xff]  }
 0x35d   : > { %v779_v45 = vmul.f32 %v1611_v39, %v1909_v58  ;;  %v790_v51 = vrot.slane %v783_v42, %v1884_v34  ;;  %v1588_v39 = vld [vmem:[%s2093_s13] sm:$0xff]  }
 0x35e   : > { %v807_v48 = vcombine.low %v780_v37, %v782_v41  ;;  %v1586_v37 = vld [vmem:[%s2091_s11] sm:$0xff]  }
 0x35f   : > { %v1613_v43 = vpop.eup %1612  ;;  %v816_v54 = vcombine.high %v790_v51, %v798_v47  ;;  %v815_v55 = vcombine.low %v790_v51, %v798_v47  ;;  %v1413_v47 = vld [vmem:[%s2090_s10] ss:$0 sm:$0xff] }
 0x360   : > { %v781_v46 = vmul.f32 %v1613_v43, %v1893_v49  ;;  %v814_v53 = vrot.slane %v807_v48, %v1884_v34 }
 0x361   : > { %v830_v49 = vrot.slane %v816_v54, %v1886_v40  ;;  %v823_v60 = vrot.slane %v815_v55, %v1886_v40  ;;  %v1591_v54 = vld [vmem:[%s2093_s13 + $0x18] sm:$0xff]   ;;  %v1592_v55 = vld [vmem:[%s2093_s13 + $0x20] sm:$0xff]  }
 0x362   : > { %v799_v50 = vcombine.low %v779_v45, %v781_v46  ;;  %v1412_v45 = vld [vmem:[%s2089_s9] ss:$0 sm:$0xff] }
 0x364   : > { %v806_v52 = vrot.slane %v799_v50, %v1884_v34 }
 0x366   : > { %v832_v57 = vcombine.high %v806_v52, %v814_v53  ;;  %v831_v58 = vcombine.low %v806_v52, %v814_v53  ;;  %v1589_v52 = vld [vmem:[%s2093_s13 + $0x8] sm:$0xff]   ;;  %v1590_v53 = vld [vmem:[%s2093_s13 + $0x10] sm:$0xff]  }
 0x368   : > { %v846_v59 = vrot.slane %v832_v57, %v1886_v40  ;;  %v839_v61 = vrot.slane %v831_v58, %v1886_v40  ;;  %v1402_v40 = vld [vmem:[%s2086_s6] ss:$0 sm:$0xff]  ;;  %v1594_v57 = vld [vmem:[%s2093_s13 + $0x30] sm:$0xff]   ;;  %v1595_v58 = vld [vmem:[%s2093_s13 + $0x38] sm:$0xff]  }
 0x36a   : > { %v849_v62 = vcombine.low %v830_v49, %v846_v59  ;;  %v848_v63 = vcombine.high %v823_v60, %v839_v61  ;;  %v847_v0 = vcombine.low %v823_v60, %v839_v61  ;;  %v850_v34 = vcombine.high %v830_v49, %v846_v59  ;;  %v1414_v49 = vld [vmem:[%s2092_s12] ss:$0 sm:$0xff] }
 0x36c   : > { %856 = vrot.lane.b32.xlu0 %v849_v62, %s1705_s15  ;;  %852 = vrot.lane.b32.xlu1 %v848_v63, %s1706_s18  ;;  %s535_s18 = sand.u32 1, %s1680_s19  }
 0x36d   : > { %s1277_s21 = scalar_lea.sflag [#allocation3], %s535_s18 }
 0x370   : > { %860 = vrot.lane.b32.xlu1 %v850_v34, %s1707_s30  ;;  %s1391_s30 = sshll.u32 %s535_s18, 3 }
 0x371   : > { %s537_s24 = scalar_lea.vmem [#allocation2], %s1391_s30  ;;  %s1708_s30 = smov [#allocation2]  }
 0x372   : > { %s1291_s20 = sshll.u32 %s537_s24, 4  ;;  %s1622_s22 = sshll.u32 %s1708_s30, 4  ;;  %s2034_s20 = int_to_ptr.vmem [resolvable:$true] %s1291_s20  ;;  %s1623_s22 = int_to_ptr.vmem [resolvable:$false] %s1622_s22 }
 0x373   : > { %s1618_s15 = scalar_lea.vmem %s2034_s20, 128  ;;  %s1624_s16 = scalar_lea.vmem %s1623_s22, 256 }
 0x374   : > { %p1619_p12 = scmp.ne.s32.totalorder %s2034_s20, %s1618_s15  ;;  %p1625_p1 = scmp.lt.s32.totalorder %s2034_s20, %s1623_s22 }
 0x375   : > { %p1626_p2 = scmp.lt.s32.totalorder %s1624_s16, %s1618_s15 }
 0x376   : > { %p1620_p13 = pnand %p1619_p12, %p1829_p4 }
 0x377   : > { %p1627_p3 = por %p1626_p2, %p1625_p1 }
 0x378   : > { %p1621_p0 = pneg %p1620_p13 }
 0x37a   : > { %p1628_p5 = pnand %p1627_p3, %p1621_p0 }
 0x3de   : > { %v853_v1 = vpop.permute.xlu1 %852  ;;  %v857_v2 = vpop.permute.xlu0 %856 }
 0x3df   : > { %v864_v3 = vsel %vm863_vm3, %v847_v0, %v853_v1 }
 0x3e0   : > { %v866_v5 = vsel %vm865_vm4, %v864_v3, %v857_v2 }
 0x3e2   : > { %v861_v4 = vpop.permute.xlu1 %860 }
 0x3e3   : > { %v868_v6 = vsel %vm867_vm5, %v866_v5, %v861_v4 }
 0x3e4   : > { %v876_v7 = vmul.f32 %v1402_v40, %v868_v6 }
 0x3e6   : > { %v877_v10 = vpack.c.bf16 %v876_v7, %v876_v7  ;;  %v1418_v7 = vld [vmem:[%s2094_s14] ss:$0 sm:$0xff] }
 0x3e8   : > { %1469 = vmatmul.mubr.msk.bf16.vlgmr.msra.gmra.mrb[4].mxu0 %vm559_vm0, %v877_v10 }
 0x3e9   : > { %1473 = vmatpush3.bf16.msra.mxu0 %v1579_v9  ;;  %1474 = vmatprep.mubr.msk.bf16.mxu0 %vm1699_vm1, %v1698_v8 }
 0x3ea   : > { %1486 = vmatprep.subr.bf16.mxu0 %v1698_v8 }
 0x4bb   : > { %v931_v12 = vpop.f32.mrb[4].mxu0 }
 0x4bc   : > { %v937_v13 = vmax.f32 %v931_v12, 0.0  ;;  %v1470_v14 = vpop.f32.mrb[5].mxu0 }
 0x4bd   : > { %v934_v15 = vpop.f32.mrb[6].mxu0 }
 0x4be   : > { %v938_v16 = vpack.c.bf16 %v937_v13, %v937_v13  ;;  %v1471_v17 = vpop.f32.mrb[7].mxu0 }
 0x4c0   : > { %1475 = vmatmul.mubr.msk.bf16.vlgmr.msra.gmra.mrb[8].mxu0 %vm865_vm4, %v938_v16 }
 0x4c1   : > { %1490 = vmatprep.mubr.msk.bf16.mxu0 %vm1699_vm1, %v1698_v8  ;;  %1487 = vmatpush3.bf16.msra.mxu0 %v1586_v37 }
 0x4c2   : > { %1488 = vmatprep.subr.bf16.mxu0 %v1698_v8 }
 0x4c5   : > { %1489 = vmatpush3.bf16.msra.mxu0 %v1587_v38 }
 0x593   : > { %v984_v19 = vpop.f32.mrb[8].mxu0 }
 0x594   : > { %v990_v20 = vpack.c.bf16 %v984_v19, %v984_v19  ;;  %v1476_v21 = vpop.f32.mrb[9].mxu0 }
 0x595   : > { %v987_v22 = vpop.f32.mrb[10].mxu0 }
 0x596   : > { %v1477_v23 = vpop.f32.mrb[11].mxu0  ;;  %1483 = vmatmul.mubr.msk.bf16.vlgmr.msra.gmra.mrb[0].mxu1 %vm559_vm0, %v990_v20 }
 0x597   : > { %1510 = vmatprep.mubr.msk.bf16.mxu1 %vm1699_vm1, %v1698_v8  ;;  %1495 = vmatpush3.bf16.msra.mxu1 %v1588_v39 }
 0x598   : > { %1496 = vmatprep.subr.bf16.mxu1 %v1698_v8 }
 0x59b   : > { %1497 = vmatpush3.bf16.msra.mxu1 %v1589_v52 }
 0x59c   : > { %1498 = vmatprep.subr.bf16.mxu1 %v1698_v8 }
 0x59f   : > { %1499 = vmatpush3.bf16.msra.mxu1 %v1590_v53 }
 0x5a0   : > { %1500 = vmatprep.subr.bf16.mxu1 %v1698_v8 }
 0x5a3   : > { %1501 = vmatpush3.bf16.msra.mxu1 %v1591_v54 }
 0x5a4   : > { %1502 = vmatprep.subr.bf16.mxu1 %v1698_v8 }
 0x5a7   : > { %1503 = vmatpush3.bf16.msra.mxu1 %v1592_v55 }
 0x5a8   : > { %1504 = vmatprep.subr.bf16.mxu1 %v1698_v8 }
 0x5ab   : > { %1505 = vmatpush3.bf16.msra.mxu1 %v1593_v56 }
 0x5ac   : > { %1506 = vmatprep.subr.bf16.mxu1 %v1698_v8 }
 0x5af   : > { %1507 = vmatpush3.bf16.msra.mxu1 %v1594_v57 }
 0x5b0   : > { %1508 = vmatprep.subr.bf16.mxu1 %v1698_v8 }
 0x5b3   : > { %1509 = vmatpush3.bf16.msra.mxu1 %v1595_v58 }
 0x669   : > { %v1051_v25 = vpop.f32.mrb[0].mxu1 }
 0x66a   : > { %v1969_v26 = vadd.f32 %v1408_v24, %v1051_v25  ;;  %v1484_v27 = vpop.f32.mrb[1].mxu1 }
 0x66b   : > { %v1054_v28 = vpop.f32.mrb[2].mxu1 }
 0x66c   : > { %v1485_v29 = vpop.f32.mrb[3].mxu1  ;;  %v1059_v30 = vsel %vm559_vm0, %v1969_v26, 0.0 }
 0x66d   : > { %1060 = vadd.xlane.f32.xlu1 %v1059_v30 }
 0x6fa   : > { %v1061_v31 = vpop.xlane.xlu1 %1060 }
 0x6fb   : > { %v1062_v32 = vmul.f32 0.03125, %v1061_v31 }
 0x6fd   : > { %v1063_v33 = vsub.f32 %v1969_v26, %v1062_v32 }
 0x6ff   : > { %v1064_v35 = vmul.f32 %v1063_v33, %v1063_v33 }
 0x701   : > { %v1065_v36 = vsel %vm559_vm0, %v1064_v35, 0.0 }
 0x702   : > { %1066 = vadd.xlane.f32.xlu0 %v1065_v36 }
 0x78f   : > { %v1067_v41 = vpop.xlane.xlu0 %1066 }
 0x790   : > { %v1068_v42 = vmul.f32 0.03125, %v1067_v41 }
 0x792   : > { %v1069_v43 = vadd.f32 1e-05, %v1068_v42 }
 0x794   : > { %1614 = vrsqrt.f32 %v1069_v43 }
 0x79e   : > { %v1615_v44 = vpop.eup %1614 }
 0x79f   : > { %v1071_v46 = vmul.f32 %v1615_v44, %v1063_v33 }
 0x7a1   : > { %v1078_v48 = vmul.f32 %v1412_v45, %v1071_v46 }
 0x7a3   : > { %v1085_v51 = vadd.f32 %v1413_v47, %v1078_v48 }
 0x7a5   : > { %v1086_v50 = vpack.c.bf16 %v1085_v51, %v1085_v51 }
 0x7a7   : > { %1491 = vmatmul.mubr.msk.bf16.vlgmr.msra.gmra.mrb[12].mxu0 %vm559_vm0, %v1086_v50 }
 0x87a   : > { %v1147_v59 = vpop.f32.mrb[12].mxu0 }
 0x87b   : > { %v1148_v60 = vadd.f32 %v1414_v49, %v1147_v59  ;;  %v1492_v61 = vpop.f32.mrb[13].mxu0 }
 0x87c   : > { %v1150_v62 = vpop.f32.mrb[14].mxu0 }
 0x87d   : > { %v1154_v63 = vmul.f32 0.044715, %v1148_v60  ;;  %v1493_v0 = vpop.f32.mrb[15].mxu0  ;;  %v1153_v8 = vmul.f32 0.5, %v1148_v60 }
 0x87f   : > { %v1155_v34 = vmul.f32 %v1154_v63, %v1148_v60 }
 0x881   : > { %v1156_v1 = vmul.f32 %v1155_v34, %v1148_v60 }
 0x883   : > { %v1157_v2 = vadd.f32 %v1156_v1, %v1148_v60 }
 0x885   : > { %v1158_v3 = vmul.f32 0.7978846, %v1157_v2 }
 0x887   : > { %1616 = vtanh.f32 %v1158_v3 }
 0x891   : > { %v1617_v40 = vpop.eup %1616 }
 0x892   : > { %v1160_v4 = vadd.f32 1.0, %v1617_v40 }
 0x894   : > { %v1161_v5 = vmul.f32 %v1160_v4, %v1153_v8 }
 0x896   : > { %v1162_v6 = vpack.c.bf16 %v1161_v5, %v1161_v5 }
 0x898   : > { %1511 = vmatmul.mubr.bf16.vlgmr.msra.gmra.mrb[4].mxu1 %v1162_v6 }
 0x96b   : > { %v1268_v9 = vpop.f32.mrb[4].mxu1 }
 0x96c   : > { %v1269_v10 = vadd.f32 %v1418_v7, %v1268_v9  ;;  %v1512_v11 = vpop.f32.mrb[5].mxu1 }
 0x96d   : > { %v1271_v12 = vpop.f32.mrb[6].mxu1 }
 0x96e   : > { %v1274_v13 = vadd.f32 %v1269_v10, %v1969_v26  ;;  %v1513_v14 = vpop.f32.mrb[7].mxu1 }
 0x970   : > { %1275 = vst.msk [vmem:[%s537_s24] sm:$0xff] %vm559_vm0, %v1274_v13 }
 0x971   : > { %1631 = shalt.err (!%p1628_p5)
}
 0x972   : > { %s1632_s18 = scalar_lea.hbm %s2032_s26, 128  ;;  %s1636_s25 = scalar_lea.hbm %s2111_s27, 256 }
 0x973   : > { %p1633_p6 = scmp.ne.s32.totalorder %s2032_s26, %s1632_s18  ;;  %p1637_p10 = scmp.lt.u32.totalorder %s2032_s26, %s2111_s27 }
 0x974   : > { %p1638_p11 = scmp.lt.u32.totalorder %s1636_s25, %s1632_s18  ;;  %p1640_p13 = scmp.lt.u32.totalorder %s1632_s18, %s2032_s26 }
 0x975   : > { %p1634_p7 = pnand %p1633_p6, %p1829_p4 }
 0x976   : > { %p1639_p12 = por %p1638_p11, %p1637_p10 }
 0x977   : > { %p1635_p9 = pneg %p1634_p7 }
 0x978   : > { %p1641_p0 = por %p1640_p13, %p1639_p12 }
 0x97a   : > { %p1642_p1 = pnand %p1641_p0, %p1635_p9 }
 0x97c   : > { %1645 = shalt.err (!%p1642_p1)
}
 0x97d   : > { %1514 = dma.vmem_to_hbm [thread:$0]  (%p1829_p4), %s2034_s20, 128, %s2032_s26, %s1277_s21  }
 0x97e PF: > { %s2112_s15 = sld [smem:[#allocation5_spill]]  ;;  %p1520_p2 = scmp.ge.s32.totalorder %s1696_s23, 2 }
 0x980   : > { %p1517_p3 = pnand %p1520_p2, %p1836_p8 }
 0x984   : > { %s1303_s16 = sand.u32 1, %s2112_s15  }
 0x985   : > { %s1304_s17 = scalar_lea.sflag [#allocation3], %s1303_s16 }
 0x986   : > { %1671 = dma.done.wait (!%p1517_p3), %s1304_s17, 128  }
 0x987   : > { %1673 = vsyncadd (!%p1517_p3), %s1304_s17, 4294967168  ;;  %s28_s23 = sadd.s32 1, %s1696_s23   ;;  %s2114_s24 = sld [smem:[#allocation6_spill]] }
 0x988   : > { %p25_p5 = scmp.ge.s32.totalorder %s28_s23, 4   ;;  %s2115_s20 = sld [smem:[#allocation10_spill]] }
 0x989   : > { %s2116_s21 = sld [smem:[#allocation7_spill]]  ;;  %s2117_s22 = sld [smem:[#allocation8_spill]] }
 0x98a   : > { %s2118_s18 = smov %s1680_s19  ;;  %27 = sbr.rel (!%p25_p5) target bundleno = 6 (0x6), region = 121 }
 0x98d   : > { %s2119_s19 = smov %s2114_s24 }
 0x991   :  { %1309 = vsyncpa [#allocation3], 1 }
 0x992   :  { %1311 = vsyncpa [#allocation3 + $0x1], 1 }

</bundles_post_ra>
